<compile_context>
chip_gen: v7x
topology: tpu7x:2x2x1
jax: 0.10.0
libtpu: 0.0.40
codegen_flags: <defaults>
</compile_context>

<pallas_src>
import functools

import numpy as np
import jax
import jax.numpy as jnp
from jax import lax
from jax.experimental import pallas as pl
from jax.experimental.pallas import tpu as pltpu

EPS = 1e-5
K = 3  # kernel_size


# --------------------------------------------------------------------------------------
# Shared conv body: 3x3 "same" conv (== the transposed conv) for a group of B images.
# Returns acc (Cout, B*H*W) in f32.
# --------------------------------------------------------------------------------------
def _conv_group(x_ref, w_ref, *, B, H, W, Cout):
    HW = H * W
    BHW = B * HW
    Cin_p = x_ref.shape[1]

    # Load the B per-image padded flat vectors once (bf16), and the 9 weight taps once.
    xb = [x_ref[b] for b in range(B)]            # each (Cin_p, L), L = HW + 2*(W+1)
    w_all = w_ref[...]                           # (9, Cout, Cin_p) bf16

    # Left/right image-border masks, computed once (output-column indexed).
    col = lax.broadcasted_iota(jnp.int32, (Cin_p, BHW), 1) % W
    not_left = col != 0
    not_right = col != (W - 1)
    zero = jnp.zeros((Cin_p, BHW), jnp.bfloat16)

    acc = jnp.zeros((Cout, BHW), jnp.float32)
    for kh in range(K):
        for kw in range(K):
            s = kh * W + kw                      # flat lane offset for this tap
            if B > 1:
                # lane-aligned concat (HW is a multiple of 128): images side by side on lanes
                xs = jnp.concatenate([xb[b][:, s:s + HW] for b in range(B)], axis=1)
            else:
                xs = xb[0][:, s:s + HW]
            if kw == 0:
                xs = jnp.where(not_left, xs, zero)
            elif kw == K - 1:
                xs = jnp.where(not_right, xs, zero)
            # bf16 MXU dot, f32 accumulation.  Top/bottom halo rows come from the per-image
            # zero padding baked into the flat layout, so no row masks are needed.
            acc = acc + jnp.dot(w_all[kh * K + kw], xs,
                                preferred_element_type=jnp.float32)
    return acc


# --------------------------------------------------------------------------------------
# Pass 1: per-group BatchNorm partials (sum, sum of squares) of the conv output.
# --------------------------------------------------------------------------------------
def _stats_kernel(x_ref, w_ref, stats_ref, *, B, H, W, Cout):
    acc = _conv_group(x_ref, w_ref, B=B, H=H, W=W, Cout=Cout)       # (Cout, B*HW) f32
    ssum = jnp.sum(acc, axis=1, keepdims=True)                       # (Cout, 1)
    ssq = jnp.sum(acc * acc, axis=1, keepdims=True)                  # (Cout, 1)
    stats_ref[0] = jnp.concatenate([ssum, ssq], axis=1)              # (Cout, 2) packed


# --------------------------------------------------------------------------------------
# Pass 2: recompute conv, then y = relu(conv * scale + shift), stored per image (NCHW).
# --------------------------------------------------------------------------------------
def _bn_relu_kernel(x_ref, w_ref, scale_ref, shift_ref, y_ref, *, B, H, W, Cout):
    HW = H * W
    acc = _conv_group(x_ref, w_ref, B=B, H=H, W=W, Cout=Cout)        # (Cout, B*HW) f32
    scale = scale_ref[...]                                           # (Cout, 1)
    shift = shift_ref[...]                                           # (Cout, 1)
    for b in range(B):
        yb = acc[:, b * HW:(b + 1) * HW] * scale + shift             # lane-aligned slice
        y_ref[b] = jnp.maximum(yb, 0.0)                              # lane-dense store


# --------------------------------------------------------------------------------------
# Block-batch selection
# --------------------------------------------------------------------------------------
def _choose_block_batch(N, HW, cin_p, cout, L):
    """Largest divisor B of N that widens the matmul lanes while keeping >=2 grid steps
    (so the 'parallel' axis can split across TensorCores) and a small per-step footprint."""
    bytes_per_image = cin_p * L * 2 + cout * HW * 4     # x block (bf16) + y block (f32)
    vmem_budget = 8 * 1024 * 1024                       # per block, well under scoped VMEM
    lane_target = max(1, -(-2048 // HW))                # aim for >= 2048 output lanes / step
    best = 1
    for b in range(1, N + 1):
        if N % b:
            continue
        if b > lane_target or b * bytes_per_image > vmem_budget:
            break
        if N // b >= 2 or N == 1:
            best = b
    return best


# --------------------------------------------------------------------------------------
# Wrapper
# --------------------------------------------------------------------------------------
def conv_transpose_block(x_nchw, w_t, bias, gamma, beta):
    """
    x_nchw: (N, Cin, H, W) f32        (PyTorch layout; output layout identical)
    w_t:    (Cin, Cout, K, K)         ConvTranspose2d weight (PyTorch layout)
    bias, gamma, beta: (Cout,)
    returns (N, Cout, H, W) f32
    """
    N, Cin, H, W = x_nchw.shape
    Cout = w_t.shape[1]
    HW = H * W
    L = HW + 2 * (W + 1)
    Cin_p = ((Cin + 7) // 8) * 8                        # sublane-aligned channel count

    B = _choose_block_batch(N, HW, Cin_p, Cout, L)
    G = N // B

    # NCHW kept; spatial flattened (free reshape); channels zero-padded to a sublane
    # multiple; per-image flat halo pad (covers top/bottom rows); bf16 for HBM/MXU.
    x_flat = x_nchw.reshape(N, Cin, HW)
    x_flat = jnp.pad(x_flat, ((0, 0), (0, Cin_p - Cin), (0, 0)))
    x_pad = jnp.pad(x_flat, ((0, 0), (0, 0), (W + 1, W + 1))).astype(jnp.bfloat16)  # (N,Cin_p,L)

    # ConvTranspose2d(k=3, s=1, p=1) == same-conv with flipped kernel & swapped channels:
    #   w_conv[co, ci, kh, kw] = w_t[ci, co, K-1-kh, K-1-kw]
    w_conv = jnp.transpose(w_t[:, :, ::-1, ::-1], (1, 0, 2, 3))          # (Cout, Cin, K, K)
    w_tap = jnp.transpose(w_conv, (2, 3, 0, 1)).reshape(K * K, Cout, Cin)  # tap-major
    w_tap = jnp.pad(w_tap, ((0, 0), (0, 0), (0, Cin_p - Cin))).astype(jnp.bfloat16)

    # `bias` is exactly cancelled by the train-mode BatchNorm mean subtraction -> unused
    # for the forward output (running-stats bookkeeping would need it back).
    del bias

    params = pltpu.CompilerParams(
        dimension_semantics=("parallel",),
        vmem_limit_bytes=32 * 1024 * 1024)   # safe on v5e/v6e (128 MiB) and v7x (64 MiB)

    # -------- pass 1: per-group BN partials (no f32 intermediate written to HBM) --------
    stats = pl.pallas_call(
        functools.partial(_stats_kernel, B=B, H=H, W=W, Cout=Cout),
        grid=(G,),
        in_specs=[
            pl.BlockSpec((B, Cin_p, L), lambda g: (g, 0, 0)),
            pl.BlockSpec((K * K, Cout, Cin_p), lambda g: (0, 0, 0)),
        ],
        out_specs=pl.BlockSpec((1, Cout, 2), lambda g: (g, 0, 0)),
        out_shape=jax.ShapeDtypeStruct((G, Cout, 2), jnp.float32),
        compiler_params=params,
    )(x_pad, w_tap)

    # -------- tiny XLA reduction: batch statistics -> per-channel scale / shift --------
    cnt = float(N * HW)
    mean = jnp.sum(stats[:, :, 0], axis=0) / cnt                     # (Cout,)
    ex2 = jnp.sum(stats[:, :, 1], axis=0) / cnt
    var = ex2 - mean * mean                                          # biased variance (train BN)
    inv = lax.rsqrt(var + EPS)
    g32 = gamma.astype(jnp.float32)
    scale = (g32 * inv).reshape(Cout, 1)
    shift = (beta.astype(jnp.float32) - mean * g32 * inv).reshape(Cout, 1)

    # -------- pass 2: recompute conv, normalize + ReLU, lane-dense f32 NCHW output --------
    y_flat = pl.pallas_call(
        functools.partial(_bn_relu_kernel, B=B, H=H, W=W, Cout=Cout),
        grid=(G,),
        in_specs=[
            pl.BlockSpec((B, Cin_p, L), lambda g: (g, 0, 0)),
            pl.BlockSpec((K * K, Cout, Cin_p), lambda g: (0, 0, 0)),
            pl.BlockSpec((Cout, 1), lambda g: (0, 0)),
            pl.BlockSpec((Cout, 1), lambda g: (0, 0)),
        ],
        out_specs=pl.BlockSpec((B, Cout, HW), lambda g: (g, 0, 0)),
        out_shape=jax.ShapeDtypeStruct((N, Cout, HW), jnp.float32),
        compiler_params=params,
    )(x_pad, w_tap, scale, shift)

    return y_flat.reshape(N, Cout, H, W)   # free reshape: already NCHW-contiguous


# --------------------------------------------------------------------------------------
# Reference + test
# --------------------------------------------------------------------------------------
def _reference_numpy(x, w_t, bias, gamma, beta):
    """Direct scatter-style ConvTranspose2d + train-mode BN + ReLU in numpy (f64)."""
    N, Cin, H, W = x.shape
    Cout = w_t.shape[1]
    full = np.zeros((N, Cout, H + K - 1, W + K - 1), np.float64)
    for kh in range(K):
        for kw in range(K):
            full[:, :, kh:kh + H, kw:kw + W] += np.einsum(
                'nchw,cd->ndhw', x.astype(np.float64), w_t[:, :, kh, kw].astype(np.float64))
    y = full[:, :, 1:1 + H, 1:1 + W] + bias[None, :, None, None]   # crop padding=1
    mean = y.mean(axis=(0, 2, 3), keepdims=True)
    var = y.var(axis=(0, 2, 3), keepdims=True)                     # biased
    yhat = (y - mean) / np.sqrt(var + EPS)
    out = gamma[None, :, None, None] * yhat + beta[None, :, None, None]
    return np.maximum(out, 0.0)


if __name__ == "__main__":
    N, Cin, Cout, H, W = 4, 4, 8, 16, 16   # N=4 -> B=2 images per grid step, grid=(2,)

    key = jax.random.PRNGKey(0)
    kx, kw_, kb = jax.random.split(key, 3)

    x = jax.random.normal(kx, (N, Cin, H, W), jnp.float32)
    # ConvTranspose2d weight shape: (in_channels, out_channels, K, K)
    w_t = jax.random.normal(kw_, (Cin, Cout, K, K), jnp.float32) * 0.2
    bias = jax.random.normal(kb, (Cout,), jnp.float32) * 0.1
    gamma = 1.0 + 0.1 * jnp.arange(Cout, dtype=jnp.float32)
    beta = 0.05 * jnp.arange(Cout, dtype=jnp.float32)

    fn = jax.jit(conv_transpose_block)
    y = jax.block_until_ready(fn(x, w_t, bias, gamma, beta))

    # Reference uses the same bf16-rounded conv operands the kernel feeds the MXU (f32/f64
    # accumulation in both), so only accumulation-order differences remain.
    x_bf = np.asarray(x.astype(jnp.bfloat16).astype(jnp.float32))
    w_bf = np.asarray(w_t.astype(jnp.bfloat16).astype(jnp.float32))
    ref = _reference_numpy(x_bf, w_bf, np.asarray(bias), np.asarray(gamma), np.asarray(beta))
    np.testing.assert_allclose(np.asarray(y), ref, rtol=1e-3, atol=1e-3)

    print("KERNEL_OK")
</pallas_src>

<mosaic_0001>
module attributes {stable_mosaic.version = 11 : i64} {
  func.func @_stats_kernel(%arg0: i32, %arg1: memref<2x8x290xbf16, #tpu.memory_space<vmem>>, %arg2: memref<9x8x8xbf16, #tpu.memory_space<vmem>>, %arg3: memref<1x8x2xf32, #tpu.memory_space<vmem>>) attributes {dimension_semantics = [#tpu.dimension_semantics<parallel>], iteration_bounds = array<i64: 2>, scalar_prefetch = 0 : i64, scratch_operands = 0 : i64, tpu.core_type = #tpu.core_type<tc>, window_params = [{transform_indices = @transform_0, window_bounds = array<i64: 2, 8, 290>}, {pipeline_mode = #tpu.pipeline_mode<synchronous>, transform_indices = @transform_1, window_bounds = array<i64: 9, 8, 8>}, {transform_indices = @transform_2, window_bounds = array<i64: 1, 8, 2>}]} {
    %c0 = arith.constant 0 : index
    %c0_0 = arith.constant 0 : index
    %c0_1 = arith.constant 0 : index
    %0 = vector.load %arg1[%c0, %c0_0, %c0_1] : memref<2x8x290xbf16, #tpu.memory_space<vmem>>, vector<1x8x290xbf16>
    %1 = vector.shape_cast %0 : vector<1x8x290xbf16> to vector<8x290xbf16>
    %c1 = arith.constant 1 : index
    %c0_2 = arith.constant 0 : index
    %c0_3 = arith.constant 0 : index
    %2 = vector.load %arg1[%c1, %c0_2, %c0_3] : memref<2x8x290xbf16, #tpu.memory_space<vmem>>, vector<1x8x290xbf16>
    %3 = vector.shape_cast %2 : vector<1x8x290xbf16> to vector<8x290xbf16>
    %c0_4 = arith.constant 0 : index
    %c0_5 = arith.constant 0 : index
    %c0_6 = arith.constant 0 : index
    %4 = vector.load %arg2[%c0_4, %c0_5, %c0_6] : memref<9x8x8xbf16, #tpu.memory_space<vmem>>, vector<9x8x8xbf16>
    %5 = tpu.iota {dimensions = array<i32: 1>} : vector<8x512xi32>
    %c16_i32 = arith.constant 16 : i32
    %c0_i32 = arith.constant 0 : i32
    %6 = arith.cmpi eq, %c16_i32, %c0_i32 : i32
    %c1_i32 = arith.constant 1 : i32
    %7 = arith.select %6, %c1_i32, %c16_i32 : i32
    %8 = vector.broadcast %7 : i32 to vector<8x512xi32>
    %9 = arith.remsi %5, %8 : vector<8x512xi32>
    %c0_i32_7 = arith.constant 0 : i32
    %10 = vector.broadcast %c0_i32_7 : i32 to vector<8x512xi32>
    %11 = arith.cmpi ne, %9, %10 : vector<8x512xi32>
    %c0_i32_8 = arith.constant 0 : i32
    %12 = vector.broadcast %c0_i32_8 : i32 to vector<8x512xi32>
    %13 = arith.cmpi slt, %9, %12 : vector<8x512xi32>
    %c0_i32_9 = arith.constant 0 : i32
    %14 = arith.cmpi slt, %7, %c0_i32_9 : i32
    %15 = vector.broadcast %14 : i1 to vector<8x512xi1>
    %16 = vector.broadcast %15 : vector<8x512xi1> to vector<8x512xi1>
    %17 = arith.xori %13, %16 : vector<8x512xi1>
    %18 = arith.andi %17, %11 : vector<8x512xi1>
    %19 = vector.broadcast %7 : i32 to vector<8x512xi32>
    %20 = arith.addi %9, %19 : vector<8x512xi32>
    %21 = arith.select %18, %20, %9 : vector<8x512xi1>, vector<8x512xi32>
    %c0_i32_10 = arith.constant 0 : i32
    %22 = vector.broadcast %c0_i32_10 : i32 to vector<8x512xi32>
    %23 = arith.cmpi ne, %21, %22 : vector<8x512xi32>
    %c15_i32 = arith.constant 15 : i32
    %24 = vector.broadcast %c15_i32 : i32 to vector<8x512xi32>
    %25 = arith.cmpi ne, %21, %24 : vector<8x512xi32>
    %cst = arith.constant 0.000000e+00 : bf16
    %26 = vector.broadcast %cst : bf16 to vector<8x512xbf16>
    %cst_11 = arith.constant 0.000000e+00 : f32
    %27 = vector.broadcast %cst_11 : f32 to vector<8x512xf32>
    %28 = vector.extract_strided_slice %1 {offsets = [0, 0], sizes = [8, 256], strides = [1, 1]} : vector<8x290xbf16> to vector<8x256xbf16>
    %29 = vector.extract_strided_slice %3 {offsets = [0, 0], sizes = [8, 256], strides = [1, 1]} : vector<8x290xbf16> to vector<8x256xbf16>
    %30 = tpu.concatenate %28, %29 in 1 : vector<8x256xbf16>, vector<8x256xbf16> -> vector<8x512xbf16>
    %31 = arith.select %23, %30, %26 : vector<8x512xi1>, vector<8x512xbf16>
    %32 = vector.extract_strided_slice %4 {offsets = [0, 0, 0], sizes = [1, 8, 8], strides = [1, 1, 1]} : vector<9x8x8xbf16> to vector<1x8x8xbf16>
    %33 = vector.shape_cast %32 : vector<1x8x8xbf16> to vector<8x8xbf16>
    %cst_12 = arith.constant dense<0.000000e+00> : vector<8x512xf32>
    %34 = tpu.matmul %33, %31, %cst_12 {dimension_numbers = #tpu.dot_dimension_numbers<[1], [0], [0], [1], [0, 0, 1, 1], [], []>} : vector<8x8xbf16>, vector<8x512xbf16>, vector<8x512xf32> -> vector<8x512xf32>
    %35 = arith.addf %27, %34 : vector<8x512xf32>
    %36 = vector.extract_strided_slice %1 {offsets = [0, 1], sizes = [8, 256], strides = [1, 1]} : vector<8x290xbf16> to vector<8x256xbf16>
    %37 = vector.extract_strided_slice %3 {offsets = [0, 1], sizes = [8, 256], strides = [1, 1]} : vector<8x290xbf16> to vector<8x256xbf16>
    %38 = tpu.concatenate %36, %37 in 1 : vector<8x256xbf16>, vector<8x256xbf16> -> vector<8x512xbf16>
    %39 = vector.extract_strided_slice %4 {offsets = [1, 0, 0], sizes = [1, 8, 8], strides = [1, 1, 1]} : vector<9x8x8xbf16> to vector<1x8x8xbf16>
    %40 = vector.shape_cast %39 : vector<1x8x8xbf16> to vector<8x8xbf16>
    %cst_13 = arith.constant dense<0.000000e+00> : vector<8x512xf32>
    %41 = tpu.matmul %40, %38, %cst_13 {dimension_numbers = #tpu.dot_dimension_numbers<[1], [0], [0], [1], [0, 0, 1, 1], [], []>} : vector<8x8xbf16>, vector<8x512xbf16>, vector<8x512xf32> -> vector<8x512xf32>
    %42 = arith.addf %35, %41 : vector<8x512xf32>
    %43 = vector.extract_strided_slice %1 {offsets = [0, 2], sizes = [8, 256], strides = [1, 1]} : vector<8x290xbf16> to vector<8x256xbf16>
    %44 = vector.extract_strided_slice %3 {offsets = [0, 2], sizes = [8, 256], strides = [1, 1]} : vector<8x290xbf16> to vector<8x256xbf16>
    %45 = tpu.concatenate %43, %44 in 1 : vector<8x256xbf16>, vector<8x256xbf16> -> vector<8x512xbf16>
    %46 = arith.select %25, %45, %26 : vector<8x512xi1>, vector<8x512xbf16>
    %47 = vector.extract_strided_slice %4 {offsets = [2, 0, 0], sizes = [1, 8, 8], strides = [1, 1, 1]} : vector<9x8x8xbf16> to vector<1x8x8xbf16>
    %48 = vector.shape_cast %47 : vector<1x8x8xbf16> to vector<8x8xbf16>
    %cst_14 = arith.constant dense<0.000000e+00> : vector<8x512xf32>
    %49 = tpu.matmul %48, %46, %cst_14 {dimension_numbers = #tpu.dot_dimension_numbers<[1], [0], [0], [1], [0, 0, 1, 1], [], []>} : vector<8x8xbf16>, vector<8x512xbf16>, vector<8x512xf32> -> vector<8x512xf32>
    %50 = arith.addf %42, %49 : vector<8x512xf32>
    %51 = vector.extract_strided_slice %1 {offsets = [0, 16], sizes = [8, 256], strides = [1, 1]} : vector<8x290xbf16> to vector<8x256xbf16>
    %52 = vector.extract_strided_slice %3 {offsets = [0, 16], sizes = [8, 256], strides = [1, 1]} : vector<8x290xbf16> to vector<8x256xbf16>
    %53 = tpu.concatenate %51, %52 in 1 : vector<8x256xbf16>, vector<8x256xbf16> -> vector<8x512xbf16>
    %54 = arith.select %23, %53, %26 : vector<8x512xi1>, vector<8x512xbf16>
    %55 = vector.extract_strided_slice %4 {offsets = [3, 0, 0], sizes = [1, 8, 8], strides = [1, 1, 1]} : vector<9x8x8xbf16> to vector<1x8x8xbf16>
    %56 = vector.shape_cast %55 : vector<1x8x8xbf16> to vector<8x8xbf16>
    %cst_15 = arith.constant dense<0.000000e+00> : vector<8x512xf32>
    %57 = tpu.matmul %56, %54, %cst_15 {dimension_numbers = #tpu.dot_dimension_numbers<[1], [0], [0], [1], [0, 0, 1, 1], [], []>} : vector<8x8xbf16>, vector<8x512xbf16>, vector<8x512xf32> -> vector<8x512xf32>
    %58 = arith.addf %50, %57 : vector<8x512xf32>
    %59 = vector.extract_strided_slice %1 {offsets = [0, 17], sizes = [8, 256], strides = [1, 1]} : vector<8x290xbf16> to vector<8x256xbf16>
    %60 = vector.extract_strided_slice %3 {offsets = [0, 17], sizes = [8, 256], strides = [1, 1]} : vector<8x290xbf16> to vector<8x256xbf16>
    %61 = tpu.concatenate %59, %60 in 1 : vector<8x256xbf16>, vector<8x256xbf16> -> vector<8x512xbf16>
    %62 = vector.extract_strided_slice %4 {offsets = [4, 0, 0], sizes = [1, 8, 8], strides = [1, 1, 1]} : vector<9x8x8xbf16> to vector<1x8x8xbf16>
    %63 = vector.shape_cast %62 : vector<1x8x8xbf16> to vector<8x8xbf16>
    %cst_16 = arith.constant dense<0.000000e+00> : vector<8x512xf32>
    %64 = tpu.matmul %63, %61, %cst_16 {dimension_numbers = #tpu.dot_dimension_numbers<[1], [0], [0], [1], [0, 0, 1, 1], [], []>} : vector<8x8xbf16>, vector<8x512xbf16>, vector<8x512xf32> -> vector<8x512xf32>
    %65 = arith.addf %58, %64 : vector<8x512xf32>
    %66 = vector.extract_strided_slice %1 {offsets = [0, 18], sizes = [8, 256], strides = [1, 1]} : vector<8x290xbf16> to vector<8x256xbf16>
    %67 = vector.extract_strided_slice %3 {offsets = [0, 18], sizes = [8, 256], strides = [1, 1]} : vector<8x290xbf16> to vector<8x256xbf16>
    %68 = tpu.concatenate %66, %67 in 1 : vector<8x256xbf16>, vector<8x256xbf16> -> vector<8x512xbf16>
    %69 = arith.select %25, %68, %26 : vector<8x512xi1>, vector<8x512xbf16>
    %70 = vector.extract_strided_slice %4 {offsets = [5, 0, 0], sizes = [1, 8, 8], strides = [1, 1, 1]} : vector<9x8x8xbf16> to vector<1x8x8xbf16>
    %71 = vector.shape_cast %70 : vector<1x8x8xbf16> to vector<8x8xbf16>
    %cst_17 = arith.constant dense<0.000000e+00> : vector<8x512xf32>
    %72 = tpu.matmul %71, %69, %cst_17 {dimension_numbers = #tpu.dot_dimension_numbers<[1], [0], [0], [1], [0, 0, 1, 1], [], []>} : vector<8x8xbf16>, vector<8x512xbf16>, vector<8x512xf32> -> vector<8x512xf32>
    %73 = arith.addf %65, %72 : vector<8x512xf32>
    %74 = vector.extract_strided_slice %1 {offsets = [0, 32], sizes = [8, 256], strides = [1, 1]} : vector<8x290xbf16> to vector<8x256xbf16>
    %75 = vector.extract_strided_slice %3 {offsets = [0, 32], sizes = [8, 256], strides = [1, 1]} : vector<8x290xbf16> to vector<8x256xbf16>
    %76 = tpu.concatenate %74, %75 in 1 : vector<8x256xbf16>, vector<8x256xbf16> -> vector<8x512xbf16>
    %77 = arith.select %23, %76, %26 : vector<8x512xi1>, vector<8x512xbf16>
    %78 = vector.extract_strided_slice %4 {offsets = [6, 0, 0], sizes = [1, 8, 8], strides = [1, 1, 1]} : vector<9x8x8xbf16> to vector<1x8x8xbf16>
    %79 = vector.shape_cast %78 : vector<1x8x8xbf16> to vector<8x8xbf16>
    %cst_18 = arith.constant dense<0.000000e+00> : vector<8x512xf32>
    %80 = tpu.matmul %79, %77, %cst_18 {dimension_numbers = #tpu.dot_dimension_numbers<[1], [0], [0], [1], [0, 0, 1, 1], [], []>} : vector<8x8xbf16>, vector<8x512xbf16>, vector<8x512xf32> -> vector<8x512xf32>
    %81 = arith.addf %73, %80 : vector<8x512xf32>
    %82 = vector.extract_strided_slice %1 {offsets = [0, 33], sizes = [8, 256], strides = [1, 1]} : vector<8x290xbf16> to vector<8x256xbf16>
    %83 = vector.extract_strided_slice %3 {offsets = [0, 33], sizes = [8, 256], strides = [1, 1]} : vector<8x290xbf16> to vector<8x256xbf16>
    %84 = tpu.concatenate %82, %83 in 1 : vector<8x256xbf16>, vector<8x256xbf16> -> vector<8x512xbf16>
    %85 = vector.extract_strided_slice %4 {offsets = [7, 0, 0], sizes = [1, 8, 8], strides = [1, 1, 1]} : vector<9x8x8xbf16> to vector<1x8x8xbf16>
    %86 = vector.shape_cast %85 : vector<1x8x8xbf16> to vector<8x8xbf16>
    %cst_19 = arith.constant dense<0.000000e+00> : vector<8x512xf32>
    %87 = tpu.matmul %86, %84, %cst_19 {dimension_numbers = #tpu.dot_dimension_numbers<[1], [0], [0], [1], [0, 0, 1, 1], [], []>} : vector<8x8xbf16>, vector<8x512xbf16>, vector<8x512xf32> -> vector<8x512xf32>
    %88 = arith.addf %81, %87 : vector<8x512xf32>
    %89 = vector.extract_strided_slice %1 {offsets = [0, 34], sizes = [8, 256], strides = [1, 1]} : vector<8x290xbf16> to vector<8x256xbf16>
    %90 = vector.extract_strided_slice %3 {offsets = [0, 34], sizes = [8, 256], strides = [1, 1]} : vector<8x290xbf16> to vector<8x256xbf16>
    %91 = tpu.concatenate %89, %90 in 1 : vector<8x256xbf16>, vector<8x256xbf16> -> vector<8x512xbf16>
    %92 = arith.select %25, %91, %26 : vector<8x512xi1>, vector<8x512xbf16>
    %93 = vector.extract_strided_slice %4 {offsets = [8, 0, 0], sizes = [1, 8, 8], strides = [1, 1, 1]} : vector<9x8x8xbf16> to vector<1x8x8xbf16>
    %94 = vector.shape_cast %93 : vector<1x8x8xbf16> to vector<8x8xbf16>
    %cst_20 = arith.constant dense<0.000000e+00> : vector<8x512xf32>
    %95 = tpu.matmul %94, %92, %cst_20 {dimension_numbers = #tpu.dot_dimension_numbers<[1], [0], [0], [1], [0, 0, 1, 1], [], []>} : vector<8x8xbf16>, vector<8x512xbf16>, vector<8x512xf32> -> vector<8x512xf32>
    %96 = arith.addf %88, %95 : vector<8x512xf32>
    %cst_21 = arith.constant dense<0.000000e+00> : vector<8xf32>
    %97 = vector.multi_reduction <add>, %96, %cst_21 [1] : vector<8x512xf32> to vector<8xf32>
    %98 = vector.shape_cast %97 : vector<8xf32> to vector<8x1xf32>
    %99 = arith.mulf %96, %96 : vector<8x512xf32>
    %cst_22 = arith.constant dense<0.000000e+00> : vector<8xf32>
    %100 = vector.multi_reduction <add>, %99, %cst_22 [1] : vector<8x512xf32> to vector<8xf32>
    %101 = vector.shape_cast %100 : vector<8xf32> to vector<8x1xf32>
    %102 = tpu.concatenate %98, %101 in 1 : vector<8x1xf32>, vector<8x1xf32> -> vector<8x2xf32>
    %c0_23 = arith.constant 0 : index
    %c0_24 = arith.constant 0 : index
    %c0_25 = arith.constant 0 : index
    %103 = vector.load %arg3[%c0_23, %c0_24, %c0_25] : memref<1x8x2xf32, #tpu.memory_space<vmem>>, vector<1x8x2xf32>
    %104 = vector.shape_cast %103 : vector<1x8x2xf32> to vector<8x2xf32>
    %105 = vector.shape_cast %102 : vector<8x2xf32> to vector<1x8x2xf32>
    tpu.vector_store %arg3[%c0_23, %c0_24, %c0_25], %105 {strides = array<i32>} : memref<1x8x2xf32, #tpu.memory_space<vmem>>, vector<1x8x2xf32>,
    return
  }
  func.func @transform_0(%arg0: i32) -> (i32, i32, i32) {
    %c0_i32 = arith.constant 0 : i32
    %c0_i32_0 = arith.constant 0 : i32
    %c0_i32_1 = arith.constant 0 : i32
    return %arg0, %c0_i32, %c0_i32_0 : i32, i32, i32
  }
  func.func @transform_1(%arg0: i32) -> (i32, i32, i32) {
    %c0_i32 = arith.constant 0 : i32
    %c0_i32_0 = arith.constant 0 : i32
    %c0_i32_1 = arith.constant 0 : i32
    %c0_i32_2 = arith.constant 0 : i32
    return %c0_i32, %c0_i32_0, %c0_i32_1 : i32, i32, i32
  }
  func.func @transform_2(%arg0: i32) -> (i32, i32, i32) {
    %c0_i32 = arith.constant 0 : i32
    %c0_i32_0 = arith.constant 0 : i32
    %c0_i32_1 = arith.constant 0 : i32
    return %arg0, %c0_i32, %c0_i32_0 : i32, i32, i32
  }
}

module attributes {stable_mosaic.version = 11 : i64} {
  func.func @_bn_relu_kernel(%arg0: i32, %arg1: memref<2x8x290xbf16, #tpu.memory_space<vmem>>, %arg2: memref<9x8x8xbf16, #tpu.memory_space<vmem>>, %arg3: memref<8x1xf32, #tpu.memory_space<vmem>>, %arg4: memref<8x1xf32, #tpu.memory_space<vmem>>, %arg5: memref<2x8x256xf32, #tpu.memory_space<vmem>>) attributes {dimension_semantics = [#tpu.dimension_semantics<parallel>], iteration_bounds = array<i64: 2>, scalar_prefetch = 0 : i64, scratch_operands = 0 : i64, tpu.core_type = #tpu.core_type<tc>, window_params = [{transform_indices = @transform_0, window_bounds = array<i64: 2, 8, 290>}, {pipeline_mode = #tpu.pipeline_mode<synchronous>, transform_indices = @transform_1, window_bounds = array<i64: 9, 8, 8>}, {pipeline_mode = #tpu.pipeline_mode<synchronous>, transform_indices = @transform_2, window_bounds = array<i64: 8, 1>}, {pipeline_mode = #tpu.pipeline_mode<synchronous>, transform_indices = @transform_3, window_bounds = array<i64: 8, 1>}, {transform_indices = @transform_4, window_bounds = array<i64: 2, 8, 256>}]} {
    %c0 = arith.constant 0 : index
    %c0_0 = arith.constant 0 : index
    %c0_1 = arith.constant 0 : index
    %0 = vector.load %arg1[%c0, %c0_0, %c0_1] : memref<2x8x290xbf16, #tpu.memory_space<vmem>>, vector<1x8x290xbf16>
    %1 = vector.shape_cast %0 : vector<1x8x290xbf16> to vector<8x290xbf16>
    %c1 = arith.constant 1 : index
    %c0_2 = arith.constant 0 : index
    %c0_3 = arith.constant 0 : index
    %2 = vector.load %arg1[%c1, %c0_2, %c0_3] : memref<2x8x290xbf16, #tpu.memory_space<vmem>>, vector<1x8x290xbf16>
    %3 = vector.shape_cast %2 : vector<1x8x290xbf16> to vector<8x290xbf16>
    %c0_4 = arith.constant 0 : index
    %c0_5 = arith.constant 0 : index
    %c0_6 = arith.constant 0 : index
    %4 = vector.load %arg2[%c0_4, %c0_5, %c0_6] : memref<9x8x8xbf16, #tpu.memory_space<vmem>>, vector<9x8x8xbf16>
    %5 = tpu.iota {dimensions = array<i32: 1>} : vector<8x512xi32>
    %c16_i32 = arith.constant 16 : i32
    %c0_i32 = arith.constant 0 : i32
    %6 = arith.cmpi eq, %c16_i32, %c0_i32 : i32
    %c1_i32 = arith.constant 1 : i32
    %7 = arith.select %6, %c1_i32, %c16_i32 : i32
    %8 = vector.broadcast %7 : i32 to vector<8x512xi32>
    %9 = arith.remsi %5, %8 : vector<8x512xi32>
    %c0_i32_7 = arith.constant 0 : i32
    %10 = vector.broadcast %c0_i32_7 : i32 to vector<8x512xi32>
    %11 = arith.cmpi ne, %9, %10 : vector<8x512xi32>
    %c0_i32_8 = arith.constant 0 : i32
    %12 = vector.broadcast %c0_i32_8 : i32 to vector<8x512xi32>
    %13 = arith.cmpi slt, %9, %12 : vector<8x512xi32>
    %c0_i32_9 = arith.constant 0 : i32
    %14 = arith.cmpi slt, %7, %c0_i32_9 : i32
    %15 = vector.broadcast %14 : i1 to vector<8x512xi1>
    %16 = vector.broadcast %15 : vector<8x512xi1> to vector<8x512xi1>
    %17 = arith.xori %13, %16 : vector<8x512xi1>
    %18 = arith.andi %17, %11 : vector<8x512xi1>
    %19 = vector.broadcast %7 : i32 to vector<8x512xi32>
    %20 = arith.addi %9, %19 : vector<8x512xi32>
    %21 = arith.select %18, %20, %9 : vector<8x512xi1>, vector<8x512xi32>
    %c0_i32_10 = arith.constant 0 : i32
    %22 = vector.broadcast %c0_i32_10 : i32 to vector<8x512xi32>
    %23 = arith.cmpi ne, %21, %22 : vector<8x512xi32>
    %c15_i32 = arith.constant 15 : i32
    %24 = vector.broadcast %c15_i32 : i32 to vector<8x512xi32>
    %25 = arith.cmpi ne, %21, %24 : vector<8x512xi32>
    %cst = arith.constant 0.000000e+00 : bf16
    %26 = vector.broadcast %cst : bf16 to vector<8x512xbf16>
    %cst_11 = arith.constant 0.000000e+00 : f32
    %27 = vector.broadcast %cst_11 : f32 to vector<8x512xf32>
    %28 = vector.extract_strided_slice %1 {offsets = [0, 0], sizes = [8, 256], strides = [1, 1]} : vector<8x290xbf16> to vector<8x256xbf16>
    %29 = vector.extract_strided_slice %3 {offsets = [0, 0], sizes = [8, 256], strides = [1, 1]} : vector<8x290xbf16> to vector<8x256xbf16>
    %30 = tpu.concatenate %28, %29 in 1 : vector<8x256xbf16>, vector<8x256xbf16> -> vector<8x512xbf16>
    %31 = arith.select %23, %30, %26 : vector<8x512xi1>, vector<8x512xbf16>
    %32 = vector.extract_strided_slice %4 {offsets = [0, 0, 0], sizes = [1, 8, 8], strides = [1, 1, 1]} : vector<9x8x8xbf16> to vector<1x8x8xbf16>
    %33 = vector.shape_cast %32 : vector<1x8x8xbf16> to vector<8x8xbf16>
    %cst_12 = arith.constant dense<0.000000e+00> : vector<8x512xf32>
    %34 = tpu.matmul %33, %31, %cst_12 {dimension_numbers = #tpu.dot_dimension_numbers<[1], [0], [0], [1], [0, 0, 1, 1], [], []>} : vector<8x8xbf16>, vector<8x512xbf16>, vector<8x512xf32> -> vector<8x512xf32>
    %35 = arith.addf %27, %34 : vector<8x512xf32>
    %36 = vector.extract_strided_slice %1 {offsets = [0, 1], sizes = [8, 256], strides = [1, 1]} : vector<8x290xbf16> to vector<8x256xbf16>
    %37 = vector.extract_strided_slice %3 {offsets = [0, 1], sizes = [8, 256], strides = [1, 1]} : vector<8x290xbf16> to vector<8x256xbf16>
    %38 = tpu.concatenate %36, %37 in 1 : vector<8x256xbf16>, vector<8x256xbf16> -> vector<8x512xbf16>
    %39 = vector.extract_strided_slice %4 {offsets = [1, 0, 0], sizes = [1, 8, 8], strides = [1, 1, 1]} : vector<9x8x8xbf16> to vector<1x8x8xbf16>
    %40 = vector.shape_cast %39 : vector<1x8x8xbf16> to vector<8x8xbf16>
    %cst_13 = arith.constant dense<0.000000e+00> : vector<8x512xf32>
    %41 = tpu.matmul %40, %38, %cst_13 {dimension_numbers = #tpu.dot_dimension_numbers<[1], [0], [0], [1], [0, 0, 1, 1], [], []>} : vector<8x8xbf16>, vector<8x512xbf16>, vector<8x512xf32> -> vector<8x512xf32>
    %42 = arith.addf %35, %41 : vector<8x512xf32>
    %43 = vector.extract_strided_slice %1 {offsets = [0, 2], sizes = [8, 256], strides = [1, 1]} : vector<8x290xbf16> to vector<8x256xbf16>
    %44 = vector.extract_strided_slice %3 {offsets = [0, 2], sizes = [8, 256], strides = [1, 1]} : vector<8x290xbf16> to vector<8x256xbf16>
    %45 = tpu.concatenate %43, %44 in 1 : vector<8x256xbf16>, vector<8x256xbf16> -> vector<8x512xbf16>
    %46 = arith.select %25, %45, %26 : vector<8x512xi1>, vector<8x512xbf16>
    %47 = vector.extract_strided_slice %4 {offsets = [2, 0, 0], sizes = [1, 8, 8], strides = [1, 1, 1]} : vector<9x8x8xbf16> to vector<1x8x8xbf16>
    %48 = vector.shape_cast %47 : vector<1x8x8xbf16> to vector<8x8xbf16>
    %cst_14 = arith.constant dense<0.000000e+00> : vector<8x512xf32>
    %49 = tpu.matmul %48, %46, %cst_14 {dimension_numbers = #tpu.dot_dimension_numbers<[1], [0], [0], [1], [0, 0, 1, 1], [], []>} : vector<8x8xbf16>, vector<8x512xbf16>, vector<8x512xf32> -> vector<8x512xf32>
    %50 = arith.addf %42, %49 : vector<8x512xf32>
    %51 = vector.extract_strided_slice %1 {offsets = [0, 16], sizes = [8, 256], strides = [1, 1]} : vector<8x290xbf16> to vector<8x256xbf16>
    %52 = vector.extract_strided_slice %3 {offsets = [0, 16], sizes = [8, 256], strides = [1, 1]} : vector<8x290xbf16> to vector<8x256xbf16>
    %53 = tpu.concatenate %51, %52 in 1 : vector<8x256xbf16>, vector<8x256xbf16> -> vector<8x512xbf16>
    %54 = arith.select %23, %53, %26 : vector<8x512xi1>, vector<8x512xbf16>
    %55 = vector.extract_strided_slice %4 {offsets = [3, 0, 0], sizes = [1, 8, 8], strides = [1, 1, 1]} : vector<9x8x8xbf16> to vector<1x8x8xbf16>
    %56 = vector.shape_cast %55 : vector<1x8x8xbf16> to vector<8x8xbf16>
    %cst_15 = arith.constant dense<0.000000e+00> : vector<8x512xf32>
    %57 = tpu.matmul %56, %54, %cst_15 {dimension_numbers = #tpu.dot_dimension_numbers<[1], [0], [0], [1], [0, 0, 1, 1], [], []>} : vector<8x8xbf16>, vector<8x512xbf16>, vector<8x512xf32> -> vector<8x512xf32>
    %58 = arith.addf %50, %57 : vector<8x512xf32>
    %59 = vector.extract_strided_slice %1 {offsets = [0, 17], sizes = [8, 256], strides = [1, 1]} : vector<8x290xbf16> to vector<8x256xbf16>
    %60 = vector.extract_strided_slice %3 {offsets = [0, 17], sizes = [8, 256], strides = [1, 1]} : vector<8x290xbf16> to vector<8x256xbf16>
    %61 = tpu.concatenate %59, %60 in 1 : vector<8x256xbf16>, vector<8x256xbf16> -> vector<8x512xbf16>
    %62 = vector.extract_strided_slice %4 {offsets = [4, 0, 0], sizes = [1, 8, 8], strides = [1, 1, 1]} : vector<9x8x8xbf16> to vector<1x8x8xbf16>
    %63 = vector.shape_cast %62 : vector<1x8x8xbf16> to vector<8x8xbf16>
    %cst_16 = arith.constant dense<0.000000e+00> : vector<8x512xf32>
    %64 = tpu.matmul %63, %61, %cst_16 {dimension_numbers = #tpu.dot_dimension_numbers<[1], [0], [0], [1], [0, 0, 1, 1], [], []>} : vector<8x8xbf16>, vector<8x512xbf16>, vector<8x512xf32> -> vector<8x512xf32>
    %65 = arith.addf %58, %64 : vector<8x512xf32>
    %66 = vector.extract_strided_slice %1 {offsets = [0, 18], sizes = [8, 256], strides = [1, 1]} : vector<8x290xbf16> to vector<8x256xbf16>
    %67 = vector.extract_strided_slice %3 {offsets = [0, 18], sizes = [8, 256], strides = [1, 1]} : vector<8x290xbf16> to vector<8x256xbf16>
    %68 = tpu.concatenate %66, %67 in 1 : vector<8x256xbf16>, vector<8x256xbf16> -> vector<8x512xbf16>
    %69 = arith.select %25, %68, %26 : vector<8x512xi1>, vector<8x512xbf16>
    %70 = vector.extract_strided_slice %4 {offsets = [5, 0, 0], sizes = [1, 8, 8], strides = [1, 1, 1]} : vector<9x8x8xbf16> to vector<1x8x8xbf16>
    %71 = vector.shape_cast %70 : vector<1x8x8xbf16> to vector<8x8xbf16>
    %cst_17 = arith.constant dense<0.000000e+00> : vector<8x512xf32>
    %72 = tpu.matmul %71, %69, %cst_17 {dimension_numbers = #tpu.dot_dimension_numbers<[1], [0], [0], [1], [0, 0, 1, 1], [], []>} : vector<8x8xbf16>, vector<8x512xbf16>, vector<8x512xf32> -> vector<8x512xf32>
    %73 = arith.addf %65, %72 : vector<8x512xf32>
    %74 = vector.extract_strided_slice %1 {offsets = [0, 32], sizes = [8, 256], strides = [1, 1]} : vector<8x290xbf16> to vector<8x256xbf16>
    %75 = vector.extract_strided_slice %3 {offsets = [0, 32], sizes = [8, 256], strides = [1, 1]} : vector<8x290xbf16> to vector<8x256xbf16>
    %76 = tpu.concatenate %74, %75 in 1 : vector<8x256xbf16>, vector<8x256xbf16> -> vector<8x512xbf16>
    %77 = arith.select %23, %76, %26 : vector<8x512xi1>, vector<8x512xbf16>
    %78 = vector.extract_strided_slice %4 {offsets = [6, 0, 0], sizes = [1, 8, 8], strides = [1, 1, 1]} : vector<9x8x8xbf16> to vector<1x8x8xbf16>
    %79 = vector.shape_cast %78 : vector<1x8x8xbf16> to vector<8x8xbf16>
    %cst_18 = arith.constant dense<0.000000e+00> : vector<8x512xf32>
    %80 = tpu.matmul %79, %77, %cst_18 {dimension_numbers = #tpu.dot_dimension_numbers<[1], [0], [0], [1], [0, 0, 1, 1], [], []>} : vector<8x8xbf16>, vector<8x512xbf16>, vector<8x512xf32> -> vector<8x512xf32>
    %81 = arith.addf %73, %80 : vector<8x512xf32>
    %82 = vector.extract_strided_slice %1 {offsets = [0, 33], sizes = [8, 256], strides = [1, 1]} : vector<8x290xbf16> to vector<8x256xbf16>
    %83 = vector.extract_strided_slice %3 {offsets = [0, 33], sizes = [8, 256], strides = [1, 1]} : vector<8x290xbf16> to vector<8x256xbf16>
    %84 = tpu.concatenate %82, %83 in 1 : vector<8x256xbf16>, vector<8x256xbf16> -> vector<8x512xbf16>
    %85 = vector.extract_strided_slice %4 {offsets = [7, 0, 0], sizes = [1, 8, 8], strides = [1, 1, 1]} : vector<9x8x8xbf16> to vector<1x8x8xbf16>
    %86 = vector.shape_cast %85 : vector<1x8x8xbf16> to vector<8x8xbf16>
    %cst_19 = arith.constant dense<0.000000e+00> : vector<8x512xf32>
    %87 = tpu.matmul %86, %84, %cst_19 {dimension_numbers = #tpu.dot_dimension_numbers<[1], [0], [0], [1], [0, 0, 1, 1], [], []>} : vector<8x8xbf16>, vector<8x512xbf16>, vector<8x512xf32> -> vector<8x512xf32>
    %88 = arith.addf %81, %87 : vector<8x512xf32>
    %89 = vector.extract_strided_slice %1 {offsets = [0, 34], sizes = [8, 256], strides = [1, 1]} : vector<8x290xbf16> to vector<8x256xbf16>
    %90 = vector.extract_strided_slice %3 {offsets = [0, 34], sizes = [8, 256], strides = [1, 1]} : vector<8x290xbf16> to vector<8x256xbf16>
    %91 = tpu.concatenate %89, %90 in 1 : vector<8x256xbf16>, vector<8x256xbf16> -> vector<8x512xbf16>
    %92 = arith.select %25, %91, %26 : vector<8x512xi1>, vector<8x512xbf16>
    %93 = vector.extract_strided_slice %4 {offsets = [8, 0, 0], sizes = [1, 8, 8], strides = [1, 1, 1]} : vector<9x8x8xbf16> to vector<1x8x8xbf16>
    %94 = vector.shape_cast %93 : vector<1x8x8xbf16> to vector<8x8xbf16>
    %cst_20 = arith.constant dense<0.000000e+00> : vector<8x512xf32>
    %95 = tpu.matmul %94, %92, %cst_20 {dimension_numbers = #tpu.dot_dimension_numbers<[1], [0], [0], [1], [0, 0, 1, 1], [], []>} : vector<8x8xbf16>, vector<8x512xbf16>, vector<8x512xf32> -> vector<8x512xf32>
    %96 = arith.addf %88, %95 : vector<8x512xf32>
    %c0_21 = arith.constant 0 : index
    %c0_22 = arith.constant 0 : index
    %97 = vector.load %arg3[%c0_21, %c0_22] : memref<8x1xf32, #tpu.memory_space<vmem>>, vector<8x1xf32>
    %c0_23 = arith.constant 0 : index
    %c0_24 = arith.constant 0 : index
    %98 = vector.load %arg4[%c0_23, %c0_24] : memref<8x1xf32, #tpu.memory_space<vmem>>, vector<8x1xf32>
    %99 = vector.extract_strided_slice %96 {offsets = [0, 0], sizes = [8, 256], strides = [1, 1]} : vector<8x512xf32> to vector<8x256xf32>
    %100 = vector.broadcast %97 : vector<8x1xf32> to vector<8x256xf32>
    %101 = arith.mulf %99, %100 : vector<8x256xf32>
    %102 = vector.broadcast %98 : vector<8x1xf32> to vector<8x256xf32>
    %103 = arith.addf %101, %102 : vector<8x256xf32>
    %cst_25 = arith.constant 0.000000e+00 : f32
    %104 = vector.broadcast %cst_25 : f32 to vector<8x256xf32>
    %105 = arith.maximumf %103, %104 : vector<8x256xf32>
    %c0_26 = arith.constant 0 : index
    %c0_27 = arith.constant 0 : index
    %c0_28 = arith.constant 0 : index
    %106 = vector.load %arg5[%c0_26, %c0_27, %c0_28] : memref<2x8x256xf32, #tpu.memory_space<vmem>>, vector<1x8x256xf32>
    %107 = vector.shape_cast %106 : vector<1x8x256xf32> to vector<8x256xf32>
    %108 = vector.shape_cast %105 : vector<8x256xf32> to vector<1x8x256xf32>
    tpu.vector_store %arg5[%c0_26, %c0_27, %c0_28], %108 {strides = array<i32>} : memref<2x8x256xf32, #tpu.memory_space<vmem>>, vector<1x8x256xf32>,
    %109 = vector.extract_strided_slice %96 {offsets = [0, 256], sizes = [8, 256], strides = [1, 1]} : vector<8x512xf32> to vector<8x256xf32>
    %110 = vector.broadcast %97 : vector<8x1xf32> to vector<8x256xf32>
    %111 = arith.mulf %109, %110 : vector<8x256xf32>
    %112 = vector.broadcast %98 : vector<8x1xf32> to vector<8x256xf32>
    %113 = arith.addf %111, %112 : vector<8x256xf32>
    %cst_29 = arith.constant 0.000000e+00 : f32
    %114 = vector.broadcast %cst_29 : f32 to vector<8x256xf32>
    %115 = arith.maximumf %113, %114 : vector<8x256xf32>
    %c1_30 = arith.constant 1 : index
    %c0_31 = arith.constant 0 : index
    %c0_32 = arith.constant 0 : index
    %116 = vector.load %arg5[%c1_30, %c0_31, %c0_32] : memref<2x8x256xf32, #tpu.memory_space<vmem>>, vector<1x8x256xf32>
    %117 = vector.shape_cast %116 : vector<1x8x256xf32> to vector<8x256xf32>
    %118 = vector.shape_cast %115 : vector<8x256xf32> to vector<1x8x256xf32>
    tpu.vector_store %arg5[%c1_30, %c0_31, %c0_32], %118 {strides = array<i32>} : memref<2x8x256xf32, #tpu.memory_space<vmem>>, vector<1x8x256xf32>,
    return
  }
  func.func @transform_0(%arg0: i32) -> (i32, i32, i32) {
    %c0_i32 = arith.constant 0 : i32
    %c0_i32_0 = arith.constant 0 : i32
    %c0_i32_1 = arith.constant 0 : i32
    return %arg0, %c0_i32, %c0_i32_0 : i32, i32, i32
  }
  func.func @transform_1(%arg0: i32) -> (i32, i32, i32) {
    %c0_i32 = arith.constant 0 : i32
    %c0_i32_0 = arith.constant 0 : i32
    %c0_i32_1 = arith.constant 0 : i32
    %c0_i32_2 = arith.constant 0 : i32
    return %c0_i32, %c0_i32_0, %c0_i32_1 : i32, i32, i32
  }
  func.func @transform_2(%arg0: i32) -> (i32, i32) {
    %c0_i32 = arith.constant 0 : i32
    %c0_i32_0 = arith.constant 0 : i32
    %c0_i32_1 = arith.constant 0 : i32
    return %c0_i32, %c0_i32_0 : i32, i32
  }
  func.func @transform_3(%arg0: i32) -> (i32, i32) {
    %c0_i32 = arith.constant 0 : i32
    %c0_i32_0 = arith.constant 0 : i32
    %c0_i32_1 = arith.constant 0 : i32
    return %c0_i32, %c0_i32_0 : i32, i32
  }
  func.func @transform_4(%arg0: i32) -> (i32, i32, i32) {
    %c0_i32 = arith.constant 0 : i32
    %c0_i32_0 = arith.constant 0 : i32
    %c0_i32_1 = arith.constant 0 : i32
    return %arg0, %c0_i32, %c0_i32_0 : i32, i32, i32
  }
}

</mosaic_0001>

<bundles_post_ra>
// kernel: conv_transpose_block.3
= control target key start
LH: loop header
LB: loop body
LE: loop exit
PB: predicated region body
PF: predicated region fallthrough
CT: control target
= control target key end

     0   :  { %s1713_s15 = smov 0   ;;  %s2029_s0 = inlined_call_operand.vmem [shape: bf16[4,8,290], index: 0, kind: input, shape index: {}]   ;;  %s2030_s1 = inlined_call_operand.vmem [shape: bf16[9,8,8], index: 1, kind: input, shape index: {}]   ;;  %s2031_s2 = inlined_call_operand.vmem [shape: f32[8,1], index: 2, kind: input, shape index: {}]   ;;  %s2032_s3 = inlined_call_operand.vmem [shape: f32[8,1], index: 3, kind: input, shape index: {}]   ;;  %s2033_s4 = inlined_call_operand.vmem [shape: f32[4,8,256], index: 4, kind: output, shape index: {}]  }
   0x1 LB: > { %s1522_s16 = sadd.s32 4294967295, %s1677_s15   ;;  %p1526_p0 = scmp.ge.s32.totalorder %s1677_s15, 1  ;;  %s1677_s15 = sphi %s1713_s15, %s14_s15  }
   0x2   : > { %p164_p1 = scmp.lt.s32.totalorder %s1677_s15, 3 }
   0x4   : > { %p165_p2 = pnand %p1526_p0, %p164_p1 }
   0x5   : > { %s1527_s17 = sshll.u32 (!%p165_p2), %s1522_s16, 1  ;;  %v1679_v0 = vmov (!%p165_p2), 0   ;;  %s1680_s22 = smov (!%p165_p2), 127   ;;  %v223_v9 = vlaneseq (!%p165_p2)  ;;  %v1435_v12 = vld [vmem:[%s2031_s2] sm:$0xff] (!%p165_p2)  ;;  %vm335_vm9 = vcmask (!%p165_p2), 1039360   ;;  %vm353_vm11 = vcmask (!%p165_p2), 1043456  }
   0x6   : > { %168 = sbr.rel (%p165_p2) target bundleno = 464 (0x1d0), region = 36  ;;  %p193_p3 = scmp.lt.s32.totalorder (!%p165_p2), %s1527_s17, 3  ;;  %398 = vmatprep.mubr.bf16.mxu0 (!%p165_p2), %v1679_v0  ;;  %439 = vmatprep.mubr.bf16.mxu1 (!%p165_p2), %v1679_v0  ;;  %v1436_v13 = vld [vmem:[%s2032_s3] sm:$0xff] (!%p165_p2)  ;;  %v216_v30 = vld [vmem:[%s2030_s1 + $0x8] sm:$0xf] (!%p165_p2) }
   0x7   : > { %1663 = vset.pattern.permute.xlu0 (!%p165_p2), %v1679_v0  ;;  %1664 = vset.pattern.permute.xlu1 (!%p165_p2), %v1679_v0  ;;  %s1681_s23 = smov (!%p165_p2), 126   ;;  %s1682_s24 = smov (!%p165_p2), 112   ;;  %v224_v10 = vand.u32 (!%p165_p2), 127, %v223_v9  ;;  %v303_v18 = vshrl.u32 (!%p165_p2), %v223_v9, 7  ;;  %v215_v47 = vld [vmem:[%s2030_s1 + $0x4] sm:$0xf] (!%p165_p2) }
   0x8   : > { %s1683_s25 = smov (!%p165_p2), 111   ;;  %s1684_s26 = smov (!%p165_p2), 110  }
   0x9   : > { %s1685_s27 = smov (!%p165_p2), 96   ;;  %s1686_s28 = smov (!%p165_p2), 95   ;;  %v225_v11 = vadd.s32 (!%p165_p2), 128, %v224_v10  ;;  %v232_v14 = vand.u32 (!%p165_p2), 15, %v224_v10  ;;  %v226_v16 = vadd.s32 (!%p165_p2), 256, %v224_v10  ;;  %v227_v17 = vadd.s32 (!%p165_p2), 384, %v224_v10 }
   0xa   : > { %s1687_s29 = smov (!%p165_p2), 94   ;;  %v1777_v21 = vsub.s32 (!%p165_p2), 4, %v303_v18  ;;  %v1780_v23 = vsub.s32 (!%p165_p2), 0, %v303_v18  ;;  %v222_v10 = vld [vmem:[%s2030_s1 + $0x20] sm:$0xf] (!%p165_p2) }
   0xb   : > { %v239_v15 = vand.u32 (!%p165_p2), 15, %v225_v11  ;;  %vm276_vm0 = vcmp.ne.s32.totalorder (!%p165_p2), %v232_v14, 0  ;;  %v246_v19 = vand.u32 (!%p165_p2), 15, %v226_v16  ;;  %v253_v20 = vand.u32 (!%p165_p2), 15, %v227_v17 }
   0xc   : > { %vm1789_vm7 = vcmp.ne.s32.totalorder (!%p165_p2), %v232_v14, 15 }
   0xd   : > { %s2059_s17 = smov (!%p193_p3, %s1527_s17), 3  ;;  %vm277_vm1 = vcmp.ne.s32.totalorder %v239_v15, 0  ;;  %vm278_vm3 = vcmp.ne.s32.totalorder %v246_v19, 0  ;;  %vm279_vm4 = vcmp.ne.s32.totalorder %v253_v20, 0  ;;  %vm1793_vm8 = vcmp.ne.s32.totalorder %v239_v15, 15 }
   0xe   : > { %s1645_s18 = smul.u32 12, %s2059_s17  ;;  %vm298_vm2 = vmpackc.low %vm277_vm1, %vm276_vm0  ;;  %vm1815_vm13 = vcmp.ne.s32.totalorder %v246_v19, 15  ;;  %vm1829_vm0 = vcmp.ne.s32.totalorder %v253_v20, 15  ;;  %vm349_vm1 = vcmask 64512  }
   0xf   : > { %v300_v22 = vsel %vm298_vm2, 65537, %v1679_v0  ;;  %vm299_vm5 = vmpackc.low %vm279_vm4, %vm278_vm3  ;;  %vm551_vm3 = vcmask 1031168  }
  0x10   : > { %s197_s21 = scalar_lea.vmem %s2029_s0, %s1645_s18  ;;  %v309_v24 = vrot.slane %v300_v22, %v1777_v21  ;;  %v305_v26 = vrot.slane %v300_v22, %v1780_v23  ;;  %v301_v27 = vsel %vm299_vm5, 65537, %v1679_v0  ;;  %vm566_vm12 = vmpackc.low %vm1793_vm8, %vm1789_vm7 }
  0x11   : > { %v1532_v1 = vld [vmem:[%s197_s21 + $0xc] sm:$0xff]  ;;  %v1665_v2 = vld [vmem:[%s197_s21 + $0x8] ss:$0 sps:$4 sm:$0xff]   ;;  %v209_v3 = vld [vmem:[%s197_s21] sm:$0xff]  ;;  %v317_v34 = vrot.slane %v301_v27, %v1777_v21  ;;  %v313_v35 = vrot.slane %v301_v27, %v1780_v23  ;;  %v568_v48 = vsel %vm566_vm12, 65537, %v1679_v0  ;;  %vm827_vm12 = vcmask 908288  }
  0x12   : > { %333 = vrot.lane.b32.xlu1 %v1665_v2, %s1680_s22  ;;  %v1731_v4 = vcombine.low %v209_v3, %v209_v3  ;;  %v1733_v5 = vcombine.low %v1532_v1, %v1532_v1  ;;  %v1736_v6 = vcombine.high %v209_v3, %v209_v3  ;;  %v1669_v7 = vld [vmem:[%s197_s21 + $0x14] ss:$0 sps:$4 sm:$0xff]   ;;  %v1740_v8 = vcombine.high %v1532_v1, %v1532_v1  ;;  %vm567_vm2 = vmpackc.low %vm1829_vm0, %vm1815_vm13 }
  0x13   : > { %vm1785_vm6 = vcmp.ne.s16.totalorder %v309_v24, 0  ;;  %vm1797_vm10 = vcmp.ne.s16.totalorder %v305_v26, 0  ;;  %vm1821_vm14 = vcmp.ne.s16.totalorder %v317_v34, 0  ;;  %vm1825_vm15 = vcmp.ne.s16.totalorder %v313_v35, 0 }
  0x14   : > { %329 = vrot.lane.b32.xlu0 %v1731_v4, %s1680_s22  ;;  %v323_v37 = vsel %vm1785_vm6, %v1736_v6, 0  ;;  %v322_v40 = vsel %vm1797_vm10, %v1731_v4, 0  ;;  %v325_v53 = vsel %vm1821_vm14, %v1740_v8, 0  ;;  %v324_v54 = vsel %vm1825_vm15, %v1733_v5, 0 }
  0x15   : > { %v452_v50 = vsel %vm353_vm11, %v322_v40, 0  ;;  %v573_v56 = vrot.slane %v568_v48, %v1780_v23  ;;  %v577_v58 = vrot.slane %v568_v48, %v1777_v21  ;;  %v458_v60 = vsel %vm353_vm11, %v324_v54, 0  ;;  %v217_v48 = vld [vmem:[%s2030_s1 + $0xc] sm:$0xf] }
  0x16   : > { %341 = vrot.lane.b32.xlu1 %v1733_v5, %s1680_s22  ;;  %v569_v61 = vsel %vm567_vm2, 65537, %v1679_v0  ;;  %vm945_vm13 = vcmask 900096   ;;  %vm1071_vm0 = vcmask 785408  }
  0x17   : > { %vm1860_vm4 = vcmp.ne.s16.totalorder %v573_v56, 0  ;;  %vm1866_vm5 = vcmp.ne.s16.totalorder %v577_v58, 0  ;;  %v581_v3 = vrot.slane %v569_v61, %v1780_v23 }
  0x18   : > { %331 = vrot.lane.b32.xlu0 %v1736_v6, %s1680_s22 }
  0x19   : > { %vm1879_vm7 = vcmp.ne.s16.totalorder %v581_v3, 0 }
  0x1a   : > { %345 = vrot.lane.b32.xlu1 %v1669_v7, %s1680_s22 }
  0x1c   : > { %343 = vrot.lane.b32.xlu0 %v1740_v8, %s1680_s22 }
  0x1e   : > { %547 = vrot.lane.b32.xlu1 %v1736_v6, %s1681_s23 }
  0x20   : > { %545 = vrot.lane.b32.xlu0 %v1731_v4, %s1681_s23 }
  0x22   : > { %556 = vrot.lane.b32.xlu1 %v1733_v5, %s1681_s23 }
  0x24   : > { %549 = vrot.lane.b32.xlu0 %v1665_v2, %s1681_s23 }
  0x26   : > { %560 = vrot.lane.b32.xlu1 %v1669_v7, %s1681_s23 }
  0x28   : > { %558 = vrot.lane.b32.xlu0 %v1740_v8, %s1681_s23 }
  0x2a   : > { %697 = vrot.lane.b32.xlu1 %v1736_v6, %s1682_s24 }
  0x2c   : > { %695 = vrot.lane.b32.xlu0 %v1731_v4, %s1682_s24 }
  0x2e   : > { %706 = vrot.lane.b32.xlu1 %v1733_v5, %s1682_s24 }
  0x30   : > { %699 = vrot.lane.b32.xlu0 %v1665_v2, %s1682_s24 }
  0x32   : > { %710 = vrot.lane.b32.xlu1 %v1669_v7, %s1682_s24 }
  0x34   : > { %708 = vrot.lane.b32.xlu0 %v1740_v8, %s1682_s24 }
  0x36   : > { %823 = vrot.lane.b32.xlu1 %v1736_v6, %s1683_s25 }
  0x38   : > { %821 = vrot.lane.b32.xlu0 %v1731_v4, %s1683_s25 }
  0x3a   : > { %830 = vrot.lane.b32.xlu1 %v1733_v5, %s1683_s25 }
  0x3c   : > { %825 = vrot.lane.b32.xlu0 %v1665_v2, %s1683_s25 }
  0x3e   : > { %834 = vrot.lane.b32.xlu1 %v1669_v7, %s1683_s25 }
  0x40   : > { %832 = vrot.lane.b32.xlu0 %v1740_v8, %s1683_s25 }
  0x42   : > { %941 = vrot.lane.b32.xlu1 %v1736_v6, %s1684_s26 }
  0x44   : > { %939 = vrot.lane.b32.xlu0 %v1731_v4, %s1684_s26 }
  0x46   : > { %950 = vrot.lane.b32.xlu1 %v1733_v5, %s1684_s26 }
  0x48   : > { %943 = vrot.lane.b32.xlu0 %v1665_v2, %s1684_s26 }
  0x4a   : > { %954 = vrot.lane.b32.xlu1 %v1669_v7, %s1684_s26 }
  0x4c   : > { %952 = vrot.lane.b32.xlu0 %v1740_v8, %s1684_s26 }
  0x4e   : > { %1067 = vrot.lane.b32.xlu1 %v1736_v6, %s1685_s27 }
  0x50   : > { %1065 = vrot.lane.b32.xlu0 %v1731_v4, %s1685_s27 }
  0x52   : > { %1076 = vrot.lane.b32.xlu1 %v1733_v5, %s1685_s27 }
  0x54   : > { %1069 = vrot.lane.b32.xlu0 %v1665_v2, %s1685_s27 }
  0x56   : > { %1080 = vrot.lane.b32.xlu1 %v1669_v7, %s1685_s27 }
  0x58   : > { %1078 = vrot.lane.b32.xlu0 %v1740_v8, %s1685_s27 }
  0x5a   : > { %1193 = vrot.lane.b32.xlu1 %v1736_v6, %s1686_s28 }
  0x5c   : > { %1191 = vrot.lane.b32.xlu0 %v1731_v4, %s1686_s28 }
  0x5e   : > { %1200 = vrot.lane.b32.xlu1 %v1733_v5, %s1686_s28 }
  0x60   : > { %1195 = vrot.lane.b32.xlu0 %v1665_v2, %s1686_s28 }
  0x62   : > { %1204 = vrot.lane.b32.xlu1 %v1669_v7, %s1686_s28 }
  0x64   : > { %1202 = vrot.lane.b32.xlu0 %v1740_v8, %s1686_s28  ;;  %s1580_s28 = sshll.u32 %s2059_s17, 4 }
  0x65   : > { %s204_s5 = scalar_lea.vmem %s2033_s4, %s1580_s28 }
  0x66   : > { %1311 = vrot.lane.b32.xlu1 %v1736_v6, %s1687_s29 }
  0x68   : > { %1309 = vrot.lane.b32.xlu0 %v1731_v4, %s1687_s29  ;;  %v585_v4 = vrot.slane %v569_v61, %v1777_v21 }
  0x6a   : > { %1320 = vrot.lane.b32.xlu1 %v1733_v5, %s1687_s29  ;;  %vm1883_vm8 = vcmp.ne.s16.totalorder %v585_v4, 0 }
  0x6c   : > { %1313 = vrot.lane.b32.xlu0 %v1665_v2, %s1687_s29 }
  0x6e   : > { %1324 = vrot.lane.b32.xlu1 %v1669_v7, %s1687_s29 }
  0x70   : > { %1322 = vrot.lane.b32.xlu0 %v1740_v8, %s1687_s29 }
  0x72   : > { %1446 = vperm.xlu1 %1664, %v1436_v13  }
  0x74   : > { %1439 = vperm.xlu0 %1663, %v1435_v12   ;;  %v214_v12 = vld [vmem:[%s2030_s1] sm:$0xf] }
  0x84   : > { %v334_v25 = vpop.permute.xlu1 %333 }
  0x86   : > { %v330_v28 = vpop.permute.xlu0 %329 }
  0x88   : > { %v342_v32 = vpop.permute.xlu1 %341 }
  0x8a   : > { %v332_v36 = vpop.permute.xlu0 %331 }
  0x8b   : > { %v337_v38 = vsel %vm335_vm9, %v332_v36, %v334_v25  ;;  %v336_v39 = vsel %vm335_vm9, %v330_v28, %v332_v36 }
  0x8c   : > { %1540 = vmatprep.subr.msk.bf16.mxu0 %vm353_vm11, %v337_v38  ;;  %v355_v42 = vsel %vm353_vm11, %v336_v39, 0  ;;  %v346_v43 = vpop.permute.xlu1 %345 }
  0x8d   : > { %367 = vmatpush1.bf16.msra.mxu0 %v355_v42 }
  0x8e   : > { %v344_v49 = vpop.permute.xlu0 %343  ;;  %1544 = vmatprep.subr.msk.bf16.mxu0 %vm353_vm11, %v323_v37 }
  0x8f   : > { %v348_v51 = vsel %vm335_vm9, %v344_v49, %v346_v43  ;;  %v347_v52 = vsel %vm335_vm9, %v342_v32, %v344_v49  ;;  %vm701_vm9 = vcmask 916480  }
  0x90   : > { %1541 = vmatmul.mubr.msk.bf16.vlgmr.msra.gmra.mrb[0].mxu0 %vm349_vm1, %v215_v47  ;;  %1542 = vmatprep.subr.msk.bf16.mxu1 %vm353_vm11, %v348_v51  ;;  %v361_v55 = vsel %vm353_vm11, %v347_v52, 0  ;;  %v548_v57 = vpop.permute.xlu1 %547 }
  0x91   : > { %408 = vmatpush1.bf16.msra.mxu1 %v361_v55  ;;  %464 = vmatpush1.bf16.msra.mxu0 %v452_v50 }
  0x92   : > { %v546_v59 = vpop.permute.xlu0 %545  ;;  %1546 = vmatprep.subr.msk.bf16.mxu1 %vm353_vm11, %v325_v53  ;;  %495 = vmatprep.mubr.bf16.mxu0 %v1679_v0 }
  0x93   : > { %v552_v63 = vsel %vm551_vm3, %v546_v59, %v548_v57 }
  0x94   : > { %1543 = vmatmul.mubr.msk.bf16.vlgmr.msra.gmra.mrb[0].mxu1 %vm349_vm1, %v215_v47  ;;  %v557_v1 = vpop.permute.xlu1 %556  ;;  %v590_v6 = vsel %vm1860_vm4, %v552_v63, 0 }
  0x95   : > { %505 = vmatpush1.bf16.msra.mxu1 %v458_v60  ;;  %536 = vmatprep.mubr.bf16.mxu1 %v1679_v0  ;;  %v598_v14 = vsel %vm353_vm11, %v590_v6, 0 }
  0x96   : > { %v550_v5 = vpop.permute.xlu0 %549 }
  0x97   : > { %v553_v7 = vsel %vm551_vm3, %v548_v57, %v550_v5 }
  0x98   : > { %v591_v8 = vsel %vm1866_vm5, %v553_v7, 0  ;;  %v561_v9 = vpop.permute.xlu1 %560 }
  0x99   : > { %1548 = vmatprep.subr.msk.bf16.mxu0 %vm353_vm11, %v591_v8 }
  0x9a   : > { %v559_v13 = vpop.permute.xlu0 %558 }
  0x9b   : > { %v562_v15 = vsel %vm551_vm3, %v557_v1, %v559_v13  ;;  %v563_v16 = vsel %vm551_vm3, %v559_v13, %v561_v9  ;;  %v218_v1 = vld [vmem:[%s2030_s1 + $0x10] sm:$0xf] }
  0x9c   : > { %v592_v17 = vsel %vm1879_vm7, %v562_v15, 0  ;;  %v593_v18 = vsel %vm1883_vm8, %v563_v16, 0  ;;  %1545 = vmatmul.mubr.msk.bf16.vlgmr.msra.gmra.mrb[0].mxu0 %vm349_vm1, %v214_v12  ;;  %v698_v19 = vpop.permute.xlu1 %697 }
  0x9d   : > { %610 = vmatpush1.bf16.msra.mxu0 %v598_v14  ;;  %1550 = vmatprep.subr.msk.bf16.mxu1 %vm353_vm11, %v593_v18  ;;  %v604_v21 = vsel %vm353_vm11, %v592_v17, 0 }
  0x9e   : > { %v696_v20 = vpop.permute.xlu0 %695  ;;  %641 = vmatprep.mubr.bf16.mxu0 %v1679_v0 }
  0x9f   : > { %v702_v22 = vsel %vm701_vm9, %v696_v20, %v698_v19 }
  0xa0   : > { %1547 = vmatmul.mubr.msk.bf16.vlgmr.msra.gmra.mrb[0].mxu1 %vm349_vm1, %v214_v12  ;;  %v707_v23 = vpop.permute.xlu1 %706  ;;  %v716_v25 = vsel %vm1797_vm10, %v702_v22, 0 }
  0xa1   : > { %651 = vmatpush1.bf16.msra.mxu1 %v604_v21  ;;  %682 = vmatprep.mubr.bf16.mxu1 %v1679_v0  ;;  %v724_v32 = vsel %vm353_vm11, %v716_v25, 0  ;;  %v219_v21 = vld [vmem:[%s2030_s1 + $0x14] sm:$0xf] }
  0xa2   : > { %v700_v24 = vpop.permute.xlu0 %699 }
  0xa3   : > { %v703_v26 = vsel %vm701_vm9, %v698_v19, %v700_v24 }
  0xa4   : > { %v717_v27 = vsel %vm1785_vm6, %v703_v26, 0  ;;  %v711_v28 = vpop.permute.xlu1 %710 }
  0xa5   : > { %1552 = vmatprep.subr.msk.bf16.mxu0 %vm353_vm11, %v717_v27 }
  0xa6   : > { %v709_v31 = vpop.permute.xlu0 %708 }
  0xa7   : > { %v712_v34 = vsel %vm701_vm9, %v707_v23, %v709_v31  ;;  %v713_v35 = vsel %vm701_vm9, %v709_v31, %v711_v28 }
  0xa8   : > { %v718_v36 = vsel %vm1825_vm15, %v712_v34, 0  ;;  %v719_v37 = vsel %vm1821_vm14, %v713_v35, 0  ;;  %1549 = vmatmul.mubr.msk.bf16.vlgmr.msra.gmra.mrb[0].mxu0 %vm349_vm1, %v216_v30  ;;  %v824_v38 = vpop.permute.xlu1 %823  ;;  %v220_v34 = vld [vmem:[%s2030_s1 + $0x18] sm:$0xf] }
  0xa9   : > { %736 = vmatpush1.bf16.msra.mxu0 %v724_v32  ;;  %1554 = vmatprep.subr.msk.bf16.mxu1 %vm353_vm11, %v719_v37  ;;  %v730_v40 = vsel %vm353_vm11, %v718_v36, 0 }
  0xaa   : > { %v822_v39 = vpop.permute.xlu0 %821  ;;  %767 = vmatprep.mubr.bf16.mxu0 %v1679_v0 }
  0xab   : > { %v828_v43 = vsel %vm827_vm12, %v822_v39, %v824_v38 }
  0xac   : > { %1551 = vmatmul.mubr.msk.bf16.vlgmr.msra.gmra.mrb[0].mxu1 %vm349_vm1, %v216_v30  ;;  %v831_v41 = vpop.permute.xlu1 %830  ;;  %v842_v49 = vsel %vm353_vm11, %v828_v43, 0 }
  0xad   : > { %777 = vmatpush1.bf16.msra.mxu1 %v730_v40  ;;  %808 = vmatprep.mubr.bf16.mxu1 %v1679_v0 }
  0xae   : > { %v826_v42 = vpop.permute.xlu0 %825 }
  0xaf   : > { %v829_v46 = vsel %vm827_vm12, %v824_v38, %v826_v42 }
  0xb0   : > { %1556 = vmatprep.subr.msk.bf16.mxu0 %vm353_vm11, %v829_v46  ;;  %v835_v47 = vpop.permute.xlu1 %834 }
  0xb2   : > { %v833_v50 = vpop.permute.xlu0 %832 }
  0xb3   : > { %v836_v51 = vsel %vm827_vm12, %v831_v41, %v833_v50  ;;  %v837_v52 = vsel %vm827_vm12, %v833_v50, %v835_v47 }
  0xb4   : > { %1553 = vmatmul.mubr.msk.bf16.vlgmr.msra.gmra.mrb[0].mxu0 %vm349_vm1, %v217_v48  ;;  %1558 = vmatprep.subr.msk.bf16.mxu1 %vm353_vm11, %v837_v52  ;;  %v942_v53 = vpop.permute.xlu1 %941  ;;  %v848_v54 = vsel %vm353_vm11, %v836_v51, 0  ;;  %v221_v51 = vld [vmem:[%s2030_s1 + $0x1c] sm:$0xf] }
  0xb5   : > { %854 = vmatpush1.bf16.msra.mxu0 %v842_v49  ;;  %885 = vmatprep.mubr.bf16.mxu0 %v1679_v0 }
  0xb6   : > { %v940_v55 = vpop.permute.xlu0 %939 }
  0xb7   : > { %v946_v56 = vsel %vm945_vm13, %v940_v55, %v942_v53 }
  0xb8   : > { %1555 = vmatmul.mubr.msk.bf16.vlgmr.msra.gmra.mrb[0].mxu1 %vm349_vm1, %v217_v48  ;;  %v951_v57 = vpop.permute.xlu1 %950  ;;  %v960_v59 = vsel %vm1860_vm4, %v946_v56, 0 }
  0xb9   : > { %895 = vmatpush1.bf16.msra.mxu1 %v848_v54  ;;  %926 = vmatprep.mubr.bf16.mxu1 %v1679_v0  ;;  %v968_v4 = vsel %vm353_vm11, %v960_v59, 0 }
  0xba   : > { %v944_v58 = vpop.permute.xlu0 %943 }
  0xbb   : > { %v947_v60 = vsel %vm945_vm13, %v942_v53, %v944_v58 }
  0xbc   : > { %v961_v61 = vsel %vm1866_vm5, %v947_v60, 0  ;;  %v955_v63 = vpop.permute.xlu1 %954 }
  0xbd   : > { %1560 = vmatprep.subr.msk.bf16.mxu0 %vm353_vm11, %v961_v61 }
  0xbe   : > { %v953_v3 = vpop.permute.xlu0 %952 }
  0xbf   : > { %v956_v5 = vsel %vm945_vm13, %v951_v57, %v953_v3  ;;  %v957_v6 = vsel %vm945_vm13, %v953_v3, %v955_v63 }
  0xc0   : > { %v962_v7 = vsel %vm1879_vm7, %v956_v5, 0  ;;  %v963_v8 = vsel %vm1883_vm8, %v957_v6, 0  ;;  %1557 = vmatmul.mubr.msk.bf16.vlgmr.msra.gmra.mrb[0].mxu0 %vm349_vm1, %v218_v1  ;;  %v1068_v9 = vpop.permute.xlu1 %1067 }
  0xc1   : > { %980 = vmatpush1.bf16.msra.mxu0 %v968_v4  ;;  %1562 = vmatprep.subr.msk.bf16.mxu1 %vm353_vm11, %v963_v8  ;;  %v974_v13 = vsel %vm353_vm11, %v962_v7, 0 }
  0xc2   : > { %v1066_v12 = vpop.permute.xlu0 %1065  ;;  %1011 = vmatprep.mubr.bf16.mxu0 %v1679_v0 }
  0xc3   : > { %v1072_v14 = vsel %vm1071_vm0, %v1066_v12, %v1068_v9 }
  0xc4   : > { %1559 = vmatmul.mubr.msk.bf16.vlgmr.msra.gmra.mrb[0].mxu1 %vm349_vm1, %v218_v1  ;;  %v1077_v15 = vpop.permute.xlu1 %1076  ;;  %v1086_v17 = vsel %vm1797_vm10, %v1072_v14, 0  ;;  %vm1315_vm10 = vcmask 769024  }
  0xc5   : > { %1021 = vmatpush1.bf16.msra.mxu1 %v974_v13  ;;  %1052 = vmatprep.mubr.bf16.mxu1 %v1679_v0  ;;  %v1094_v23 = vsel %vm353_vm11, %v1086_v17, 0 }
  0xc6   : > { %v1070_v16 = vpop.permute.xlu0 %1069 }
  0xc7   : > { %v1073_v18 = vsel %vm1071_vm0, %v1068_v9, %v1070_v16 }
  0xc8   : > { %v1087_v19 = vsel %vm1785_vm6, %v1073_v18, 0  ;;  %v1081_v20 = vpop.permute.xlu1 %1080  ;;  %vm1197_vm6 = vcmask 777216  }
  0xc9   : > { %1564 = vmatprep.subr.msk.bf16.mxu0 %vm353_vm11, %v1087_v19 }
  0xca   : > { %v1079_v22 = vpop.permute.xlu0 %1078 }
  0xcb   : > { %v1082_v24 = vsel %vm1071_vm0, %v1077_v15, %v1079_v22  ;;  %v1083_v33 = vsel %vm1071_vm0, %v1079_v22, %v1081_v20 }
  0xcc   : > { %v1088_v25 = vsel %vm1825_vm15, %v1082_v24, 0  ;;  %v1089_v29 = vsel %vm1821_vm14, %v1083_v33, 0  ;;  %1561 = vmatmul.mubr.msk.bf16.vlgmr.msra.gmra.mrb[0].mxu0 %vm349_vm1, %v219_v21  ;;  %v1194_v26 = vpop.permute.xlu1 %1193 }
  0xcd   : > { %1106 = vmatpush1.bf16.msra.mxu0 %v1094_v23  ;;  %1566 = vmatprep.subr.msk.bf16.mxu1 %vm353_vm11, %v1089_v29  ;;  %v1100_v28 = vsel %vm353_vm11, %v1088_v25, 0 }
  0xce   : > { %v1192_v27 = vpop.permute.xlu0 %1191  ;;  %1137 = vmatprep.mubr.bf16.mxu0 %v1679_v0 }
  0xcf   : > { %v1198_v45 = vsel %vm1197_vm6, %v1192_v27, %v1194_v26 }
  0xd0   : > { %1563 = vmatmul.mubr.msk.bf16.vlgmr.msra.gmra.mrb[0].mxu1 %vm349_vm1, %v219_v21  ;;  %v1201_v30 = vpop.permute.xlu1 %1200  ;;  %v1212_v35 = vsel %vm353_vm11, %v1198_v45, 0 }
  0xd1   : > { %1147 = vmatpush1.bf16.msra.mxu1 %v1100_v28  ;;  %1178 = vmatprep.mubr.bf16.mxu1 %v1679_v0 }
  0xd2   : > { %v1196_v44 = vpop.permute.xlu0 %1195 }
  0xd3   : > { %v1199_v31 = vsel %vm1197_vm6, %v1194_v26, %v1196_v44 }
  0xd4   : > { %1568 = vmatprep.subr.msk.bf16.mxu0 %vm353_vm11, %v1199_v31  ;;  %v1205_v32 = vpop.permute.xlu1 %1204 }
  0xd6   : > { %v1203_v36 = vpop.permute.xlu0 %1202 }
  0xd7   : > { %v1206_v37 = vsel %vm1197_vm6, %v1201_v30, %v1203_v36  ;;  %v1207_v38 = vsel %vm1197_vm6, %v1203_v36, %v1205_v32 }
  0xd8   : > { %1565 = vmatmul.mubr.msk.bf16.vlgmr.msra.gmra.mrb[0].mxu0 %vm349_vm1, %v220_v34  ;;  %1570 = vmatprep.subr.msk.bf16.mxu1 %vm353_vm11, %v1207_v38  ;;  %v1312_v39 = vpop.permute.xlu1 %1311  ;;  %v1218_v40 = vsel %vm353_vm11, %v1206_v37, 0 }
  0xd9   : > { %1224 = vmatpush1.bf16.msra.mxu0 %v1212_v35  ;;  %1255 = vmatprep.mubr.bf16.mxu0 %v1679_v0 }
  0xda   : > { %v1310_v41 = vpop.permute.xlu0 %1309 }
  0xdb   : > { %v1316_v42 = vsel %vm1315_vm10, %v1310_v41, %v1312_v39 }
  0xdc   : > { %1567 = vmatmul.mubr.msk.bf16.vlgmr.msra.gmra.mrb[0].mxu1 %vm349_vm1, %v220_v34  ;;  %v1321_v43 = vpop.permute.xlu1 %1320  ;;  %v1330_v47 = vsel %vm1860_vm4, %v1316_v42, 0 }
  0xdd   : > { %1265 = vmatpush1.bf16.msra.mxu1 %v1218_v40  ;;  %1296 = vmatprep.mubr.bf16.mxu1 %v1679_v0  ;;  %v1338_v53 = vsel %vm353_vm11, %v1330_v47, 0 }
  0xde   : > { %v1314_v46 = vpop.permute.xlu0 %1313 }
  0xdf   : > { %v1317_v48 = vsel %vm1315_vm10, %v1312_v39, %v1314_v46 }
  0xe0   : > { %v1331_v49 = vsel %vm1866_vm5, %v1317_v48, 0  ;;  %v1325_v50 = vpop.permute.xlu1 %1324 }
  0xe1   : > { %1572 = vmatprep.subr.msk.bf16.mxu0 %vm353_vm11, %v1331_v49 }
  0xe2   : > { %v1323_v52 = vpop.permute.xlu0 %1322 }
  0xe3   : > { %v1326_v54 = vsel %vm1315_vm10, %v1321_v43, %v1323_v52  ;;  %v1327_v62 = vsel %vm1315_vm10, %v1323_v52, %v1325_v50 }
  0xe4   : > { %v1332_v55 = vsel %vm1879_vm7, %v1326_v54, 0  ;;  %v1333_v2 = vsel %vm1883_vm8, %v1327_v62, 0  ;;  %1569 = vmatmul.mubr.msk.bf16.vlgmr.msra.gmra.mrb[0].mxu0 %vm349_vm1, %v221_v51 }
  0xe5   : > { %1350 = vmatpush1.bf16.msra.mxu0 %v1338_v53  ;;  %1574 = vmatprep.subr.msk.bf16.mxu1 %vm353_vm11, %v1333_v2  ;;  %v1344_v56 = vsel %vm353_vm11, %v1332_v55, 0 }
  0xe6   : > { %1381 = vmatprep.mubr.bf16.mxu0 %v1679_v0 }
  0xe8   : > { %1571 = vmatmul.mubr.msk.bf16.vlgmr.msra.gmra.mrb[0].mxu1 %vm349_vm1, %v221_v51 }
  0xe9   : > { %1391 = vmatpush1.bf16.msra.mxu1 %v1344_v56  ;;  %1422 = vmatprep.mubr.bf16.mxu1 %v1679_v0 }
  0xf0   : > { %1573 = vmatmul.mubr.msk.bf16.vlgmr.msra.gmra.mrb[0].mxu0 %vm349_vm1, %v222_v10 }
  0xf1   : > { %v1447_v58 = vpop.permute.xlu1 %1446 }
  0xf3   : > { %v1440_v11 = vpop.permute.xlu0 %1439 }
  0xf4   : > { %1575 = vmatmul.mubr.msk.bf16.vlgmr.msra.gmra.mrb[0].mxu1 %vm349_vm1, %v222_v10 }
 0x1c3   : > { %v1383_v57 = vpop.f32.mrb[0].mxu0 }
 0x1c4   : > { %v1442_v59 = vmul.f32 %v1440_v11, %v1383_v57  ;;  %v1385_v60 = vpop.f32.mrb[1].mxu0 }
 0x1c5   : > { %v1443_v61 = vmul.f32 %v1440_v11, %v1385_v60  ;;  %v1387_v63 = vpop.f32.mrb[2].mxu0 }
 0x1c6   : > { %v1449_v1 = vadd.f32 %v1447_v58, %v1442_v59  ;;  %v1388_v3 = vpop.f32.mrb[3].mxu0 }
 0x1c7   : > { %v1450_v0 = vadd.f32 %v1447_v58, %v1443_v61  ;;  %v1424_v4 = vpop.f32.mrb[0].mxu1 }
 0x1c8   : > { %v1451_v5 = vmax.f32 %v1449_v1, 0.0  ;;  %v1455_v6 = vmul.f32 %v1440_v11, %v1424_v4  ;;  %v1426_v7 = vpop.f32.mrb[1].mxu1 }
 0x1c9   : > { %v1452_v8 = vmax.f32 %v1450_v0, 0.0  ;;  %v1456_v9 = vmul.f32 %v1440_v11, %v1426_v7  ;;  %v1428_v12 = vpop.f32.mrb[2].mxu1 }
 0x1ca   : > { %1453 = vst [vmem:[%s204_s5] sm:$0xff] %v1451_v5  ;;  %v1457_v13 = vadd.f32 %v1455_v6, %v1447_v58  ;;  %v1429_v14 = vpop.f32.mrb[3].mxu1 }
 0x1cb   : > { %1454 = vst [vmem:[%s204_s5 + $0x8] sm:$0xff] %v1452_v8  ;;  %v1458_v15 = vadd.f32 %v1456_v9, %v1447_v58 }
 0x1cc   : > { %v1459_v16 = vmax.f32 %v1457_v13, 0.0 }
 0x1cd   : > { %v1460_v17 = vmax.f32 %v1458_v15, 0.0 }
 0x1ce   : > { %1576 = vst [vmem:[%s204_s5 + $0x10] sm:$0xff] %v1459_v16 }
 0x1cf   : > { %1577 = vst [vmem:[%s204_s5 + $0x18] sm:$0xff] %v1460_v17 }
 0x1d0 PF: > { %s14_s15 = sadd.s32 1, %s1677_s15  }
 0x1d1   : > { %p11_p4 = scmp.ge.s32.totalorder %s14_s15, 4  }
 0x1d3   :  { %13 = sbr.rel (!%p11_p4) target bundleno = 1 (0x1), region = 68 }

// kernel: conv_transpose_block.2
= control target key start
LH: loop header
LB: loop body
LE: loop exit
PB: predicated region body
PF: predicated region fallthrough
CT: control target
= control target key end

     0   :  { %s1621_s9 = smov 0   ;;  %s1930_s0 = inlined_call_operand.vmem [shape: bf16[4,8,290], index: 0, kind: input, shape index: {}]   ;;  %s1931_s1 = inlined_call_operand.vmem [shape: bf16[9,8,8], index: 1, kind: input, shape index: {}]   ;;  %s1932_s2 = inlined_call_operand.vmem [shape: f32[2,8,2], index: 2, kind: output, shape index: {}]  }
   0x1 LB: > { %s1627_s10 = sadd.s32 4294967295, %s1595_s9   ;;  %p1451_p0 = scmp.ge.s32.totalorder %s1595_s9, 1  ;;  %s1595_s9 = sphi %s1621_s9, %s12_s9  }
   0x2   : > { %p114_p1 = scmp.lt.s32.totalorder %s1595_s9, 3 }
   0x4   : > { %p115_p2 = pnand %p1451_p0, %p114_p1 }
   0x5   : > { %s1452_s11 = sshll.u32 (!%p115_p2), %s1627_s10, 1  ;;  %v1597_v0 = vmov (!%p115_p2), 0   ;;  %s1598_s16 = smov (!%p115_p2), 127   ;;  %v164_v9 = vlaneseq (!%p115_p2)  ;;  %vm276_vm9 = vcmask (!%p115_p2), 1039360   ;;  %vm294_vm11 = vcmask (!%p115_p2), 1043456  }
   0x6   : > { %118 = sbr.rel (%p115_p2) target bundleno = 606 (0x25e), region = 28  ;;  %p137_p3 = scmp.lt.s32.totalorder (!%p115_p2), %s1452_s11, 3  ;;  %339 = vmatprep.mubr.bf16.mxu0 (!%p115_p2), %v1597_v0  ;;  %380 = vmatprep.mubr.bf16.mxu1 (!%p115_p2), %v1597_v0  ;;  %v156_v45 = vld [vmem:[%s1931_s1 + $0x4] sm:$0xf] (!%p115_p2)  ;;  %v157_v28 = vld [vmem:[%s1931_s1 + $0x8] sm:$0xf] (!%p115_p2) }
   0x7   : > { %s1599_s17 = smov (!%p115_p2), 126   ;;  %s1600_s18 = smov (!%p115_p2), 112   ;;  %v165_v10 = vand.u32 (!%p115_p2), 127, %v164_v9  ;;  %v244_v16 = vshrl.u32 (!%p115_p2), %v164_v9, 7 }
   0x8   : > { %s1601_s19 = smov (!%p115_p2), 111   ;;  %s1602_s20 = smov (!%p115_p2), 110  }
   0x9   : > { %s1603_s21 = smov (!%p115_p2), 96   ;;  %s1604_s22 = smov (!%p115_p2), 95   ;;  %v166_v11 = vadd.s32 (!%p115_p2), 128, %v165_v10  ;;  %v173_v12 = vand.u32 (!%p115_p2), 15, %v165_v10  ;;  %v167_v14 = vadd.s32 (!%p115_p2), 256, %v165_v10  ;;  %v168_v15 = vadd.s32 (!%p115_p2), 384, %v165_v10 }
   0xa   : > { %s1605_s23 = smov (!%p115_p2), 94   ;;  %v1677_v19 = vsub.s32 (!%p115_p2), 4, %v244_v16  ;;  %v1680_v21 = vsub.s32 (!%p115_p2), 0, %v244_v16  ;;  %v155_v10 = vld [vmem:[%s1931_s1] sm:$0xf] (!%p115_p2)  ;;  %p143_p4 = scmp.lt.s32.totalorder (!%p115_p2), %s1627_s10, 1 }
   0xb   : > { %v180_v13 = vand.u32 (!%p115_p2), 15, %v166_v11  ;;  %vm217_vm0 = vcmp.ne.s32.totalorder (!%p115_p2), %v173_v12, 0  ;;  %v187_v17 = vand.u32 (!%p115_p2), 15, %v167_v14  ;;  %v194_v18 = vand.u32 (!%p115_p2), 15, %v168_v15 }
   0xc   : > { %vm1689_vm7 = vcmp.ne.s32.totalorder (!%p115_p2), %v173_v12, 15 }
   0xd   : > { %s1958_s11 = smov (!%p137_p3, %s1452_s11), 3  ;;  %vm218_vm1 = vcmp.ne.s32.totalorder %v180_v13, 0  ;;  %vm219_vm3 = vcmp.ne.s32.totalorder %v187_v17, 0  ;;  %vm220_vm4 = vcmp.ne.s32.totalorder %v194_v18, 0  ;;  %vm1693_vm8 = vcmp.ne.s32.totalorder %v180_v13, 15  ;;  %s1960_s10 = smov (!%p143_p4, %s1627_s10), 1 }
   0xe   : > { %s1565_s12 = smul.u32 12, %s1958_s11  ;;  %vm239_vm2 = vmpackc.low %vm218_vm1, %vm217_vm0  ;;  %vm1715_vm13 = vcmp.ne.s32.totalorder %v187_v17, 15  ;;  %vm1729_vm0 = vcmp.ne.s32.totalorder %v194_v18, 15  ;;  %vm290_vm1 = vcmask 64512  }
   0xf   : > { %v241_v20 = vsel %vm239_vm2, 65537, %v1597_v0  ;;  %vm240_vm5 = vmpackc.low %vm220_vm4, %vm219_vm3  ;;  %vm492_vm3 = vcmask 1031168  }
  0x10   : > { %s141_s15 = scalar_lea.vmem %s1930_s0, %s1565_s12  ;;  %v250_v22 = vrot.slane %v241_v20, %v1677_v19  ;;  %v246_v24 = vrot.slane %v241_v20, %v1680_v21  ;;  %v242_v25 = vsel %vm240_vm5, 65537, %v1597_v0  ;;  %vm507_vm12 = vmpackc.low %vm1693_vm8, %vm1689_vm7 }
  0x11   : > { %v1455_v1 = vld [vmem:[%s141_s15 + $0xc] sm:$0xff]  ;;  %v1583_v2 = vld [vmem:[%s141_s15 + $0x8] ss:$0 sps:$4 sm:$0xff]   ;;  %v150_v3 = vld [vmem:[%s141_s15] sm:$0xff]  ;;  %v258_v32 = vrot.slane %v242_v25, %v1677_v19  ;;  %v254_v33 = vrot.slane %v242_v25, %v1680_v21  ;;  %v509_v46 = vsel %vm507_vm12, 65537, %v1597_v0  ;;  %vm768_vm12 = vcmask 908288  }
  0x12   : > { %274 = vrot.lane.b32.xlu1 %v1583_v2, %s1598_s16  ;;  %v1637_v4 = vcombine.low %v150_v3, %v150_v3  ;;  %v1639_v5 = vcombine.low %v1455_v1, %v1455_v1  ;;  %v1642_v6 = vcombine.high %v150_v3, %v150_v3  ;;  %v1587_v7 = vld [vmem:[%s141_s15 + $0x14] ss:$0 sps:$4 sm:$0xff]   ;;  %v1646_v8 = vcombine.high %v1455_v1, %v1455_v1  ;;  %vm508_vm2 = vmpackc.low %vm1729_vm0, %vm1715_vm13 }
  0x13   : > { %vm1685_vm6 = vcmp.ne.s16.totalorder %v250_v22, 0  ;;  %vm1697_vm10 = vcmp.ne.s16.totalorder %v246_v24, 0  ;;  %vm1721_vm14 = vcmp.ne.s16.totalorder %v258_v32, 0  ;;  %vm1725_vm15 = vcmp.ne.s16.totalorder %v254_v33, 0 }
  0x14   : > { %270 = vrot.lane.b32.xlu0 %v1637_v4, %s1598_s16  ;;  %v264_v35 = vsel %vm1685_vm6, %v1642_v6, 0  ;;  %v263_v38 = vsel %vm1697_vm10, %v1637_v4, 0  ;;  %v266_v51 = vsel %vm1721_vm14, %v1646_v8, 0  ;;  %v265_v52 = vsel %vm1725_vm15, %v1639_v5, 0 }
  0x15   : > { %v393_v48 = vsel %vm294_vm11, %v263_v38, 0  ;;  %v514_v54 = vrot.slane %v509_v46, %v1680_v21  ;;  %v518_v56 = vrot.slane %v509_v46, %v1677_v19  ;;  %v399_v58 = vsel %vm294_vm11, %v265_v52, 0  ;;  %v158_v46 = vld [vmem:[%s1931_s1 + $0xc] sm:$0xf] }
  0x16   : > { %282 = vrot.lane.b32.xlu1 %v1639_v5, %s1598_s16  ;;  %v510_v59 = vsel %vm508_vm2, 65537, %v1597_v0  ;;  %vm886_vm13 = vcmask 900096   ;;  %vm1012_vm0 = vcmask 785408  }
  0x17   : > { %vm1760_vm4 = vcmp.ne.s16.totalorder %v514_v54, 0  ;;  %vm1766_vm5 = vcmp.ne.s16.totalorder %v518_v56, 0  ;;  %v522_v1 = vrot.slane %v510_v59, %v1680_v21 }
  0x18   : > { %272 = vrot.lane.b32.xlu0 %v1642_v6, %s1598_s16 }
  0x19   : > { %vm1779_vm7 = vcmp.ne.s16.totalorder %v522_v1, 0 }
  0x1a   : > { %286 = vrot.lane.b32.xlu1 %v1587_v7, %s1598_s16 }
  0x1c   : > { %284 = vrot.lane.b32.xlu0 %v1646_v8, %s1598_s16  ;;  %s1454_s16 = sshll.u32 %s1960_s10, 3 }
  0x1e   : > { %488 = vrot.lane.b32.xlu1 %v1642_v6, %s1599_s17 }
  0x20   : > { %486 = vrot.lane.b32.xlu0 %v1637_v4, %s1599_s17 }
  0x22   : > { %497 = vrot.lane.b32.xlu1 %v1639_v5, %s1599_s17 }
  0x24   : > { %490 = vrot.lane.b32.xlu0 %v1583_v2, %s1599_s17 }
  0x26   : > { %501 = vrot.lane.b32.xlu1 %v1587_v7, %s1599_s17 }
  0x28   : > { %499 = vrot.lane.b32.xlu0 %v1646_v8, %s1599_s17 }
  0x2a   : > { %638 = vrot.lane.b32.xlu1 %v1642_v6, %s1600_s18 }
  0x2c   : > { %636 = vrot.lane.b32.xlu0 %v1637_v4, %s1600_s18 }
  0x2e   : > { %647 = vrot.lane.b32.xlu1 %v1639_v5, %s1600_s18 }
  0x30   : > { %640 = vrot.lane.b32.xlu0 %v1583_v2, %s1600_s18 }
  0x32   : > { %651 = vrot.lane.b32.xlu1 %v1587_v7, %s1600_s18 }
  0x34   : > { %649 = vrot.lane.b32.xlu0 %v1646_v8, %s1600_s18 }
  0x36   : > { %764 = vrot.lane.b32.xlu1 %v1642_v6, %s1601_s19 }
  0x38   : > { %762 = vrot.lane.b32.xlu0 %v1637_v4, %s1601_s19 }
  0x3a   : > { %771 = vrot.lane.b32.xlu1 %v1639_v5, %s1601_s19 }
  0x3c   : > { %766 = vrot.lane.b32.xlu0 %v1583_v2, %s1601_s19 }
  0x3e   : > { %775 = vrot.lane.b32.xlu1 %v1587_v7, %s1601_s19 }
  0x40   : > { %773 = vrot.lane.b32.xlu0 %v1646_v8, %s1601_s19  ;;  %s146_s19 = scalar_lea.vmem %s1932_s2, %s1454_s16 }
  0x42   : > { %882 = vrot.lane.b32.xlu1 %v1642_v6, %s1602_s20 }
  0x44   : > { %880 = vrot.lane.b32.xlu0 %v1637_v4, %s1602_s20 }
  0x46   : > { %891 = vrot.lane.b32.xlu1 %v1639_v5, %s1602_s20 }
  0x48   : > { %884 = vrot.lane.b32.xlu0 %v1583_v2, %s1602_s20 }
  0x4a   : > { %895 = vrot.lane.b32.xlu1 %v1587_v7, %s1602_s20 }
  0x4c   : > { %893 = vrot.lane.b32.xlu0 %v1646_v8, %s1602_s20 }
  0x4e   : > { %1008 = vrot.lane.b32.xlu1 %v1642_v6, %s1603_s21 }
  0x50   : > { %1006 = vrot.lane.b32.xlu0 %v1637_v4, %s1603_s21 }
  0x52   : > { %1017 = vrot.lane.b32.xlu1 %v1639_v5, %s1603_s21 }
  0x54   : > { %1010 = vrot.lane.b32.xlu0 %v1583_v2, %s1603_s21 }
  0x56   : > { %1021 = vrot.lane.b32.xlu1 %v1587_v7, %s1603_s21 }
  0x58   : > { %1019 = vrot.lane.b32.xlu0 %v1646_v8, %s1603_s21 }
  0x5a   : > { %1134 = vrot.lane.b32.xlu1 %v1642_v6, %s1604_s22 }
  0x5c   : > { %1132 = vrot.lane.b32.xlu0 %v1637_v4, %s1604_s22 }
  0x5e   : > { %1141 = vrot.lane.b32.xlu1 %v1639_v5, %s1604_s22 }
  0x60   : > { %1136 = vrot.lane.b32.xlu0 %v1583_v2, %s1604_s22 }
  0x62   : > { %1145 = vrot.lane.b32.xlu1 %v1587_v7, %s1604_s22 }
  0x64   : > { %1143 = vrot.lane.b32.xlu0 %v1646_v8, %s1604_s22 }
  0x66   : > { %1252 = vrot.lane.b32.xlu1 %v1642_v6, %s1605_s23 }
  0x68   : > { %1250 = vrot.lane.b32.xlu0 %v1637_v4, %s1605_s23 }
  0x6a   : > { %1261 = vrot.lane.b32.xlu1 %v1639_v5, %s1605_s23 }
  0x6c   : > { %1254 = vrot.lane.b32.xlu0 %v1583_v2, %s1605_s23  ;;  %v526_v2 = vrot.slane %v510_v59, %v1677_v19 }
  0x6e   : > { %1265 = vrot.lane.b32.xlu1 %v1587_v7, %s1605_s23  ;;  %vm1783_vm8 = vcmp.ne.s16.totalorder %v526_v2, 0 }
  0x70   : > { %1263 = vrot.lane.b32.xlu0 %v1646_v8, %s1605_s23  ;;  %v163_v8 = vld [vmem:[%s1931_s1 + $0x20] sm:$0xf] }
  0x84   : > { %v275_v23 = vpop.permute.xlu1 %274 }
  0x86   : > { %v271_v26 = vpop.permute.xlu0 %270 }
  0x88   : > { %v283_v30 = vpop.permute.xlu1 %282 }
  0x8a   : > { %v273_v34 = vpop.permute.xlu0 %272 }
  0x8b   : > { %v278_v36 = vsel %vm276_vm9, %v273_v34, %v275_v23  ;;  %v277_v37 = vsel %vm276_vm9, %v271_v26, %v273_v34 }
  0x8c   : > { %1463 = vmatprep.subr.msk.bf16.mxu0 %vm294_vm11, %v278_v36  ;;  %v296_v40 = vsel %vm294_vm11, %v277_v37, 0  ;;  %v287_v41 = vpop.permute.xlu1 %286 }
  0x8d   : > { %308 = vmatpush1.bf16.msra.mxu0 %v296_v40 }
  0x8e   : > { %v285_v47 = vpop.permute.xlu0 %284  ;;  %1467 = vmatprep.subr.msk.bf16.mxu0 %vm294_vm11, %v264_v35 }
  0x8f   : > { %v289_v49 = vsel %vm276_vm9, %v285_v47, %v287_v41  ;;  %v288_v50 = vsel %vm276_vm9, %v283_v30, %v285_v47  ;;  %vm642_vm9 = vcmask 916480  }
  0x90   : > { %1464 = vmatmul.mubr.msk.bf16.vlgmr.msra.gmra.mrb[0].mxu0 %vm290_vm1, %v156_v45  ;;  %1465 = vmatprep.subr.msk.bf16.mxu1 %vm294_vm11, %v289_v49  ;;  %v302_v53 = vsel %vm294_vm11, %v288_v50, 0  ;;  %v489_v55 = vpop.permute.xlu1 %488 }
  0x91   : > { %349 = vmatpush1.bf16.msra.mxu1 %v302_v53  ;;  %405 = vmatpush1.bf16.msra.mxu0 %v393_v48 }
  0x92   : > { %v487_v57 = vpop.permute.xlu0 %486  ;;  %1469 = vmatprep.subr.msk.bf16.mxu1 %vm294_vm11, %v266_v51  ;;  %436 = vmatprep.mubr.bf16.mxu0 %v1597_v0 }
  0x93   : > { %v493_v61 = vsel %vm492_vm3, %v487_v57, %v489_v55 }
  0x94   : > { %1466 = vmatmul.mubr.msk.bf16.vlgmr.msra.gmra.mrb[0].mxu1 %vm290_vm1, %v156_v45  ;;  %v498_v62 = vpop.permute.xlu1 %497  ;;  %v531_v4 = vsel %vm1760_vm4, %v493_v61, 0 }
  0x95   : > { %446 = vmatpush1.bf16.msra.mxu1 %v399_v58  ;;  %477 = vmatprep.mubr.bf16.mxu1 %v1597_v0  ;;  %v539_v12 = vsel %vm294_vm11, %v531_v4, 0 }
  0x96   : > { %v491_v3 = vpop.permute.xlu0 %490 }
  0x97   : > { %v494_v5 = vsel %vm492_vm3, %v489_v55, %v491_v3 }
  0x98   : > { %v532_v6 = vsel %vm1766_vm5, %v494_v5, 0  ;;  %v502_v7 = vpop.permute.xlu1 %501 }
  0x99   : > { %1471 = vmatprep.subr.msk.bf16.mxu0 %vm294_vm11, %v532_v6 }
  0x9a   : > { %v500_v11 = vpop.permute.xlu0 %499 }
  0x9b   : > { %v503_v13 = vsel %vm492_vm3, %v498_v62, %v500_v11  ;;  %v504_v14 = vsel %vm492_vm3, %v500_v11, %v502_v7  ;;  %v159_v62 = vld [vmem:[%s1931_s1 + $0x10] sm:$0xf] }
  0x9c   : > { %v533_v15 = vsel %vm1779_vm7, %v503_v13, 0  ;;  %v534_v16 = vsel %vm1783_vm8, %v504_v14, 0  ;;  %1468 = vmatmul.mubr.msk.bf16.vlgmr.msra.gmra.mrb[0].mxu0 %vm290_vm1, %v155_v10  ;;  %v639_v17 = vpop.permute.xlu1 %638 }
  0x9d   : > { %551 = vmatpush1.bf16.msra.mxu0 %v539_v12  ;;  %1473 = vmatprep.subr.msk.bf16.mxu1 %vm294_vm11, %v534_v16  ;;  %v545_v19 = vsel %vm294_vm11, %v533_v15, 0 }
  0x9e   : > { %v637_v18 = vpop.permute.xlu0 %636  ;;  %582 = vmatprep.mubr.bf16.mxu0 %v1597_v0 }
  0x9f   : > { %v643_v20 = vsel %vm642_vm9, %v637_v18, %v639_v17 }
  0xa0   : > { %1470 = vmatmul.mubr.msk.bf16.vlgmr.msra.gmra.mrb[0].mxu1 %vm290_vm1, %v155_v10  ;;  %v648_v21 = vpop.permute.xlu1 %647  ;;  %v657_v23 = vsel %vm1697_vm10, %v643_v20, 0 }
  0xa1   : > { %592 = vmatpush1.bf16.msra.mxu1 %v545_v19  ;;  %623 = vmatprep.mubr.bf16.mxu1 %v1597_v0  ;;  %v665_v30 = vsel %vm294_vm11, %v657_v23, 0  ;;  %v160_v19 = vld [vmem:[%s1931_s1 + $0x14] sm:$0xf] }
  0xa2   : > { %v641_v22 = vpop.permute.xlu0 %640 }
  0xa3   : > { %v644_v24 = vsel %vm642_vm9, %v639_v17, %v641_v22 }
  0xa4   : > { %v658_v25 = vsel %vm1685_vm6, %v644_v24, 0  ;;  %v652_v26 = vpop.permute.xlu1 %651 }
  0xa5   : > { %1475 = vmatprep.subr.msk.bf16.mxu0 %vm294_vm11, %v658_v25 }
  0xa6   : > { %v650_v29 = vpop.permute.xlu0 %649 }
  0xa7   : > { %v653_v32 = vsel %vm642_vm9, %v648_v21, %v650_v29  ;;  %v654_v33 = vsel %vm642_vm9, %v650_v29, %v652_v26 }
  0xa8   : > { %v659_v34 = vsel %vm1725_vm15, %v653_v32, 0  ;;  %v660_v35 = vsel %vm1721_vm14, %v654_v33, 0  ;;  %1472 = vmatmul.mubr.msk.bf16.vlgmr.msra.gmra.mrb[0].mxu0 %vm290_vm1, %v157_v28  ;;  %v765_v36 = vpop.permute.xlu1 %764  ;;  %v161_v32 = vld [vmem:[%s1931_s1 + $0x18] sm:$0xf] }
  0xa9   : > { %677 = vmatpush1.bf16.msra.mxu0 %v665_v30  ;;  %1477 = vmatprep.subr.msk.bf16.mxu1 %vm294_vm11, %v660_v35  ;;  %v671_v38 = vsel %vm294_vm11, %v659_v34, 0 }
  0xaa   : > { %v763_v37 = vpop.permute.xlu0 %762  ;;  %708 = vmatprep.mubr.bf16.mxu0 %v1597_v0 }
  0xab   : > { %v769_v41 = vsel %vm768_vm12, %v763_v37, %v765_v36 }
  0xac   : > { %1474 = vmatmul.mubr.msk.bf16.vlgmr.msra.gmra.mrb[0].mxu1 %vm290_vm1, %v157_v28  ;;  %v772_v39 = vpop.permute.xlu1 %771  ;;  %v783_v47 = vsel %vm294_vm11, %v769_v41, 0 }
  0xad   : > { %718 = vmatpush1.bf16.msra.mxu1 %v671_v38  ;;  %749 = vmatprep.mubr.bf16.mxu1 %v1597_v0 }
  0xae   : > { %v767_v40 = vpop.permute.xlu0 %766 }
  0xaf   : > { %v770_v44 = vsel %vm768_vm12, %v765_v36, %v767_v40 }
  0xb0   : > { %1479 = vmatprep.subr.msk.bf16.mxu0 %vm294_vm11, %v770_v44  ;;  %v776_v45 = vpop.permute.xlu1 %775 }
  0xb2   : > { %v774_v48 = vpop.permute.xlu0 %773 }
  0xb3   : > { %v777_v49 = vsel %vm768_vm12, %v772_v39, %v774_v48  ;;  %v778_v50 = vsel %vm768_vm12, %v774_v48, %v776_v45 }
  0xb4   : > { %1476 = vmatmul.mubr.msk.bf16.vlgmr.msra.gmra.mrb[0].mxu0 %vm290_vm1, %v158_v46  ;;  %1481 = vmatprep.subr.msk.bf16.mxu1 %vm294_vm11, %v778_v50  ;;  %v883_v51 = vpop.permute.xlu1 %882  ;;  %v789_v52 = vsel %vm294_vm11, %v777_v49, 0  ;;  %v162_v49 = vld [vmem:[%s1931_s1 + $0x1c] sm:$0xf] }
  0xb5   : > { %795 = vmatpush1.bf16.msra.mxu0 %v783_v47  ;;  %826 = vmatprep.mubr.bf16.mxu0 %v1597_v0 }
  0xb6   : > { %v881_v53 = vpop.permute.xlu0 %880 }
  0xb7   : > { %v887_v54 = vsel %vm886_vm13, %v881_v53, %v883_v51 }
  0xb8   : > { %1478 = vmatmul.mubr.msk.bf16.vlgmr.msra.gmra.mrb[0].mxu1 %vm290_vm1, %v158_v46  ;;  %v892_v55 = vpop.permute.xlu1 %891  ;;  %v901_v57 = vsel %vm1760_vm4, %v887_v54, 0 }
  0xb9   : > { %836 = vmatpush1.bf16.msra.mxu1 %v789_v52  ;;  %867 = vmatprep.mubr.bf16.mxu1 %v1597_v0  ;;  %v909_v2 = vsel %vm294_vm11, %v901_v57, 0 }
  0xba   : > { %v885_v56 = vpop.permute.xlu0 %884 }
  0xbb   : > { %v888_v58 = vsel %vm886_vm13, %v883_v51, %v885_v56 }
  0xbc   : > { %v902_v59 = vsel %vm1766_vm5, %v888_v58, 0  ;;  %v896_v61 = vpop.permute.xlu1 %895 }
  0xbd   : > { %1483 = vmatprep.subr.msk.bf16.mxu0 %vm294_vm11, %v902_v59 }
  0xbe   : > { %v894_v1 = vpop.permute.xlu0 %893 }
  0xbf   : > { %v897_v3 = vsel %vm886_vm13, %v892_v55, %v894_v1  ;;  %v898_v4 = vsel %vm886_vm13, %v894_v1, %v896_v61 }
  0xc0   : > { %v903_v5 = vsel %vm1779_vm7, %v897_v3, 0  ;;  %v904_v6 = vsel %vm1783_vm8, %v898_v4, 0  ;;  %1480 = vmatmul.mubr.msk.bf16.vlgmr.msra.gmra.mrb[0].mxu0 %vm290_vm1, %v159_v62  ;;  %v1009_v7 = vpop.permute.xlu1 %1008 }
  0xc1   : > { %921 = vmatpush1.bf16.msra.mxu0 %v909_v2  ;;  %1485 = vmatprep.subr.msk.bf16.mxu1 %vm294_vm11, %v904_v6  ;;  %v915_v11 = vsel %vm294_vm11, %v903_v5, 0 }
  0xc2   : > { %v1007_v10 = vpop.permute.xlu0 %1006  ;;  %952 = vmatprep.mubr.bf16.mxu0 %v1597_v0 }
  0xc3   : > { %v1013_v12 = vsel %vm1012_vm0, %v1007_v10, %v1009_v7 }
  0xc4   : > { %1482 = vmatmul.mubr.msk.bf16.vlgmr.msra.gmra.mrb[0].mxu1 %vm290_vm1, %v159_v62  ;;  %v1018_v13 = vpop.permute.xlu1 %1017  ;;  %v1027_v15 = vsel %vm1697_vm10, %v1013_v12, 0  ;;  %vm1256_vm10 = vcmask 769024  }
  0xc5   : > { %962 = vmatpush1.bf16.msra.mxu1 %v915_v11  ;;  %993 = vmatprep.mubr.bf16.mxu1 %v1597_v0  ;;  %v1035_v21 = vsel %vm294_vm11, %v1027_v15, 0 }
  0xc6   : > { %v1011_v14 = vpop.permute.xlu0 %1010 }
  0xc7   : > { %v1014_v16 = vsel %vm1012_vm0, %v1009_v7, %v1011_v14 }
  0xc8   : > { %v1028_v17 = vsel %vm1685_vm6, %v1014_v16, 0  ;;  %v1022_v18 = vpop.permute.xlu1 %1021  ;;  %vm1138_vm6 = vcmask 777216  }
  0xc9   : > { %1487 = vmatprep.subr.msk.bf16.mxu0 %vm294_vm11, %v1028_v17 }
  0xca   : > { %v1020_v20 = vpop.permute.xlu0 %1019 }
  0xcb   : > { %v1023_v22 = vsel %vm1012_vm0, %v1018_v13, %v1020_v20  ;;  %v1024_v31 = vsel %vm1012_vm0, %v1020_v20, %v1022_v18 }
  0xcc   : > { %v1029_v23 = vsel %vm1725_vm15, %v1023_v22, 0  ;;  %v1030_v27 = vsel %vm1721_vm14, %v1024_v31, 0  ;;  %1484 = vmatmul.mubr.msk.bf16.vlgmr.msra.gmra.mrb[0].mxu0 %vm290_vm1, %v160_v19  ;;  %v1135_v24 = vpop.permute.xlu1 %1134  ;;  %vm1392_vm14 = vcmask 15360  }
  0xcd   : > { %1047 = vmatpush1.bf16.msra.mxu0 %v1035_v21  ;;  %1489 = vmatprep.subr.msk.bf16.mxu1 %vm294_vm11, %v1030_v27  ;;  %v1041_v26 = vsel %vm294_vm11, %v1029_v23, 0 }
  0xce   : > { %v1133_v25 = vpop.permute.xlu0 %1132  ;;  %1078 = vmatprep.mubr.bf16.mxu0 %v1597_v0 }
  0xcf   : > { %v1139_v43 = vsel %vm1138_vm6, %v1133_v25, %v1135_v24 }
  0xd0   : > { %1486 = vmatmul.mubr.msk.bf16.vlgmr.msra.gmra.mrb[0].mxu1 %vm290_vm1, %v160_v19  ;;  %v1142_v28 = vpop.permute.xlu1 %1141  ;;  %v1153_v33 = vsel %vm294_vm11, %v1139_v43, 0 }
  0xd1   : > { %1088 = vmatpush1.bf16.msra.mxu1 %v1041_v26  ;;  %1119 = vmatprep.mubr.bf16.mxu1 %v1597_v0 }
  0xd2   : > { %v1137_v42 = vpop.permute.xlu0 %1136 }
  0xd3   : > { %v1140_v29 = vsel %vm1138_vm6, %v1135_v24, %v1137_v42 }
  0xd4   : > { %1491 = vmatprep.subr.msk.bf16.mxu0 %vm294_vm11, %v1140_v29  ;;  %v1146_v30 = vpop.permute.xlu1 %1145 }
  0xd6   : > { %v1144_v34 = vpop.permute.xlu0 %1143 }
  0xd7   : > { %v1147_v35 = vsel %vm1138_vm6, %v1142_v28, %v1144_v34  ;;  %v1148_v36 = vsel %vm1138_vm6, %v1144_v34, %v1146_v30 }
  0xd8   : > { %1488 = vmatmul.mubr.msk.bf16.vlgmr.msra.gmra.mrb[0].mxu0 %vm290_vm1, %v161_v32  ;;  %1493 = vmatprep.subr.msk.bf16.mxu1 %vm294_vm11, %v1148_v36  ;;  %v1253_v37 = vpop.permute.xlu1 %1252  ;;  %v1159_v38 = vsel %vm294_vm11, %v1147_v35, 0 }
  0xd9   : > { %1165 = vmatpush1.bf16.msra.mxu0 %v1153_v33  ;;  %1196 = vmatprep.mubr.bf16.mxu0 %v1597_v0 }
  0xda   : > { %v1251_v39 = vpop.permute.xlu0 %1250 }
  0xdb   : > { %v1257_v40 = vsel %vm1256_vm10, %v1251_v39, %v1253_v37 }
  0xdc   : > { %1490 = vmatmul.mubr.msk.bf16.vlgmr.msra.gmra.mrb[0].mxu1 %vm290_vm1, %v161_v32  ;;  %v1262_v41 = vpop.permute.xlu1 %1261  ;;  %v1271_v45 = vsel %vm1760_vm4, %v1257_v40, 0 }
  0xdd   : > { %1206 = vmatpush1.bf16.msra.mxu1 %v1159_v38  ;;  %1237 = vmatprep.mubr.bf16.mxu1 %v1597_v0  ;;  %v1279_v51 = vsel %vm294_vm11, %v1271_v45, 0 }
  0xde   : > { %v1255_v44 = vpop.permute.xlu0 %1254 }
  0xdf   : > { %v1258_v46 = vsel %vm1256_vm10, %v1253_v37, %v1255_v44 }
  0xe0   : > { %v1272_v47 = vsel %vm1766_vm5, %v1258_v46, 0  ;;  %v1266_v48 = vpop.permute.xlu1 %1265 }
  0xe1   : > { %1495 = vmatprep.subr.msk.bf16.mxu0 %vm294_vm11, %v1272_v47 }
  0xe2   : > { %v1264_v50 = vpop.permute.xlu0 %1263 }
  0xe3   : > { %v1267_v52 = vsel %vm1256_vm10, %v1262_v41, %v1264_v50  ;;  %v1268_v60 = vsel %vm1256_vm10, %v1264_v50, %v1266_v48 }
  0xe4   : > { %v1273_v53 = vsel %vm1779_vm7, %v1267_v52, 0  ;;  %v1274_v63 = vsel %vm1783_vm8, %v1268_v60, 0  ;;  %1492 = vmatmul.mubr.msk.bf16.vlgmr.msra.gmra.mrb[0].mxu0 %vm290_vm1, %v162_v49 }
  0xe5   : > { %1291 = vmatpush1.bf16.msra.mxu0 %v1279_v51  ;;  %1497 = vmatprep.subr.msk.bf16.mxu1 %vm294_vm11, %v1274_v63  ;;  %v1285_v54 = vsel %vm294_vm11, %v1273_v53, 0  ;;  %vm1390_vm11 = vcmask 7168  }
  0xe6   : > { %1322 = vmatprep.mubr.bf16.mxu0 %v1597_v0 }
  0xe8   : > { %1494 = vmatmul.mubr.msk.bf16.vlgmr.msra.gmra.mrb[0].mxu1 %vm290_vm1, %v162_v49 }
  0xe9   : > { %1332 = vmatpush1.bf16.msra.mxu1 %v1285_v54  ;;  %1363 = vmatprep.mubr.bf16.mxu1 %v1597_v0 }
  0xf0   : > { %1496 = vmatmul.mubr.msk.bf16.vlgmr.msra.gmra.mrb[0].mxu0 %vm290_vm1, %v163_v8 }
  0xf4   : > { %1498 = vmatmul.mubr.msk.bf16.vlgmr.msra.gmra.mrb[0].mxu1 %vm290_vm1, %v163_v8 }
 0x1c3   : > { %v1324_v9 = vpop.f32.mrb[0].mxu0 }
 0x1c4   : > { %v1381_v55 = vmul.f32 %v1324_v9, %v1324_v9  ;;  %v1326_v56 = vpop.f32.mrb[1].mxu0 }
 0x1c5   : > { %v1376_v57 = vadd.f32 %v1326_v56, %v1324_v9  ;;  %v1382_v58 = vmul.f32 %v1326_v56, %v1326_v56  ;;  %v1328_v59 = vpop.f32.mrb[2].mxu0 }
 0x1c6   : > { %v1329_v61 = vpop.f32.mrb[3].mxu0 }
 0x1c7   : > { %v1385_v62 = vadd.f32 %v1382_v58, %v1381_v55  ;;  %v1365_v1 = vpop.f32.mrb[0].mxu1 }
 0x1c8   : > { %v1377_v0 = vadd.f32 %v1376_v57, %v1365_v1  ;;  %v1383_v2 = vmul.f32 %v1365_v1, %v1365_v1  ;;  %v1367_v3 = vpop.f32.mrb[1].mxu1 }
 0x1c9   : > { %v1384_v4 = vmul.f32 %v1367_v3, %v1367_v3  ;;  %v1369_v5 = vpop.f32.mrb[2].mxu1 }
 0x1ca   : > { %v1370_v6 = vpop.f32.mrb[3].mxu1  ;;  %v1378_v7 = vadd.f32 %v1377_v0, %v1367_v3  ;;  %v1386_v10 = vadd.f32 %v1385_v62, %v1383_v2 }
 0x1cc   : > { %1379 = vadd.xlane.f32.xlu0 %v1378_v7  ;;  %v1387_v11 = vadd.f32 %v1386_v10, %v1384_v4 }
 0x1ce   : > { %1388 = vadd.xlane.f32.xlu1 %v1387_v11 }
 0x259   : > { %v1380_v12 = vpop.xlane.xlu0 %1379 }
 0x25b   : > { %v1389_v13 = vpop.xlane.xlu1 %1388 }
 0x25c   : > { %v1391_v14 = vsel %vm1390_vm11, %v1380_v12, %v1389_v13 }
 0x25d   : > { %1393 = vst.msk [vmem:[%s146_s19] sm:$0xff] %vm1392_vm14, %v1391_v14 }
 0x25e PF: > { %s12_s9 = sadd.s32 1, %s1595_s9  }
 0x25f   : > { %p9_p5 = scmp.ge.s32.totalorder %s12_s9, 4  }
 0x261   :  { %11 = sbr.rel (!%p9_p5) target bundleno = 1 (0x1), region = 59 }

</bundles_post_ra>
